<compile_context>
chip_gen: v6e
topology: v6e:2x2x1
jax: 0.10.0
libtpu: 0.0.40
codegen_flags: <defaults>
</compile_context>

<pallas_src>
import numpy as np
import jax
import jax.numpy as jnp
from jax import lax
from jax.experimental import pallas as pl
from jax.experimental.pallas import tpu as pltpu

# ---- static configuration (synthetic stand-ins for the module's globals) ----
N_STARS = 128         # bright_stars_count (= 128 so stars fill one lane group)
HNUM = 16
VNUM = 16
HWIN = 0.5
VWIN = 0.5
KSIZE = 5             # Gaussian blur kernel size (assumed)
SIGMA = 1.0
HV = HNUM * VNUM
META_ROWS = 8         # filt / ix / iy + 5 zero rows -> unmasked 8-sublane store


# ----------------------------- parameter setup ------------------------------
def _gauss1d(k, sigma):
    x = np.arange(k, dtype=np.float64) - (k - 1) / 2.0
    g = np.exp(-0.5 * (x / sigma) ** 2)
    return (g / g.sum()).astype(np.float32)


_G1D = _gauss1d(KSIZE, SIGMA)


def _gauss_band(n):
    """(n, n) band matrix G with G[i, j] = g1d(|i - j|); zero-padded 'same' blur."""
    c = KSIZE // 2
    m = np.zeros((n, n), np.float32)
    for i in range(n):
        for j in range(n):
            d = abs(i - j)
            if d <= c:
                m[i, j] = _G1D[c + d]
    return m


_GAUSS_BAND = _gauss_band(HNUM)          # HNUM == VNUM, symmetric -> used on both sides


# rows: westward, vertical, upward  (get_init_frame)
_FRAME0 = np.array([[0.0, 0.0, 1.0],
                    [1.0, 0.0, 0.0],
                    [0.0, 1.0, 0.0]], np.float32)


def _quat_rot(ux, uy, uz, ang):
    """Skyview.rot applied to quaternion2(ux, uy, uz, ang) -> (3,3)."""
    a = jnp.cos(ang / 2.0)
    s = jnp.sin(ang / 2.0)
    b, c, d = s * ux, s * uy, s * uz
    return jnp.stack([
        jnp.stack([a * a + b * b - c * c - d * d, 2 * (b * c - a * d), 2 * (b * d + a * c)]),
        jnp.stack([2 * (b * c + a * d), a * a + c * c - b * b - d * d, 2 * (c * d - a * b)]),
        jnp.stack([2 * (b * d - a * c), 2 * (c * d + a * b), a * a + d * d - b * b - c * c]),
    ])


def compute_transfer(theta_deg, phi_deg, alpha_deg):
    """Skyview.transfer: three axis rotations of the frame, then inverse.

    The frame is orthonormal, so the inverse is the (exact) transpose.
    """
    d2r = np.float32(np.pi / 180.0)
    th, ph, al = theta_deg * d2r, phi_deg * d2r, alpha_deg * d2r
    f0 = jnp.asarray(_FRAME0)
    west, vert, up = f0[0], f0[1], f0[2]
    r1 = _quat_rot(up[0], up[1], up[2], -th)
    r2 = _quat_rot(west[0], west[1], west[2], ph)
    r3 = _quat_rot(vert[0], vert[1], vert[2], -al)
    frame = f0 @ r1 @ r2 @ r3            # rotate_frames: row-vectors @ R
    return frame.T                       # == th.inverse(frame) for a rotation


# ------------------------------ Pallas kernel --------------------------------
def _sky_kernel(tr_ref, stars_ref, mags_ref, gauss_ref, sky_ref, meta_ref):
    b = pl.program_id(0)                 # view index (one view per grid step)

    # rotate_points: p' = transfer @ p with the 3x3 read as 9 SMEM scalars and
    # the stars lane-dense -> 9 broadcast FMAs on (1, N) rows (no MXU padding).
    s = stars_ref[...]                   # (3, N) rows = x, y, z
    x = s[0:1, :]
    y = s[1:2, :]
    z = s[2:3, :]
    rx = tr_ref[b, 0] * x + tr_ref[b, 1] * y + tr_ref[b, 2] * z
    ry = tr_ref[b, 3] * x + tr_ref[b, 4] * y + tr_ref[b, 5] * z
    rz = tr_ref[b, 6] * x + tr_ref[b, 7] * y + tr_ref[b, 8] * z

    # get_filter: torch's atan2/cos/sin chain is algebraically ux/|p|, uy/|p|,
    # uz/|p|.  rsqrt goes to the EUP.
    inv_n = lax.rsqrt(rx * rx + ry * ry + rz * rz)
    cs = rx * inv_n
    xs = ry * inv_n
    ys = rz * inv_n
    filt = ((jnp.abs(xs) < HWIN) & (jnp.abs(ys) < VWIN) & (cs > 0.0)).astype(jnp.float32)

    def _window(coord, win):
        q = coord / win
        qt = jnp.where(q >= 0.0, jnp.floor(q), jnp.ceil(q))   # trunc toward 0 (torch.fmod)
        return q - qt                                          # fmod(coord, win) / win

    ix = (HNUM // 2 + (HNUM // 2) * _window(xs, HWIN)).astype(jnp.int32)   # (1, N)
    iy = (VNUM // 2 + (VNUM // 2) * _window(ys, VWIN)).astype(jnp.int32)
    # torch's mask-multiply clamp == clip to [0, n-1] (overflow -> n-1, negative -> 0).
    ix = jnp.clip(ix, 0, HNUM - 1)
    iy = jnp.clip(iy, 0, VNUM - 1)

    # Lane-dense per-star metadata, padded to 8 sublanes -> one unmasked store.
    meta_ref[...] = jnp.concatenate(
        [filt, ix.astype(jnp.float32), iy.astype(jnp.float32),
         jnp.zeros((META_ROWS - 3, N_STARS), jnp.float32)], axis=0)        # (8, N)

    # get_img rasterization.  torch: background[:, ix, iy] = diag(mags) (last
    # write wins per pixel, filtered-out stars still block), then
    # field = sum_i filter_i * background_i -> per pixel only the LAST star
    # hitting it contributes filter*mag.  One transient (HV, N) int array.
    s_row = lax.broadcasted_iota(jnp.int32, (1, N_STARS), 1)               # star id on lanes
    pix = ix * VNUM + iy                                                   # (1, N)
    p_grid = lax.broadcasted_iota(jnp.int32, (HV, N_STARS), 0)             # pixel id on sublanes
    hit = p_grid == pix                                                    # (HV, N) mask
    win = jnp.max(jnp.where(hit, s_row + 1, 0), axis=1, keepdims=True)     # (HV, 1) winner+1
    # Each star hits exactly one pixel -> this sum is a gather of win[pix[s]].
    win_at_star = jnp.sum(jnp.where(hit, win, 0), axis=0, keepdims=True)   # (1, N)
    is_winner = (win_at_star == s_row + 1).astype(jnp.float32)             # (1, N)

    w_eff = filt * mags_ref[...] * is_winner                               # (1, N)

    # One-hot scatter + separable Gaussian blur as tiny fully-resident matmuls.
    hxf = (lax.broadcasted_iota(jnp.int32, (HNUM, N_STARS), 0) == ix).astype(jnp.float32)
    vyf = (lax.broadcasted_iota(jnp.int32, (VNUM, N_STARS), 0) == iy).astype(jnp.float32)
    img = lax.dot_general(hxf * w_eff, vyf, (((1,), (1,)), ((), ())),
                          preferred_element_type=jnp.float32)              # (16, 16) field
    g = gauss_ref[...]                                                     # (16, 16) band matrix
    sky_ref[...] = jnp.dot(jnp.dot(g, img, preferred_element_type=jnp.float32), g,
                           preferred_element_type=jnp.float32)             # (16, 16) blurred sky


def _pallas_render(transfers, stars_t, mags_row, gauss_band):
    """transfers: (B, 9) row-major 3x3 transfers; returns (sky (B,H,V), meta (B,8,N))."""
    B = transfers.shape[0]
    flops = B * (2 * HNUM * N_STARS * VNUM      # one-hot scatter matmul
                 + 4 * HNUM * VNUM * VNUM       # blur matmuls
                 + 4 * HV * N_STARS             # winner pass
                 + 64 * N_STARS)                # rotation / projection
    bytes_accessed = 4 * (B * 9 + 4 * N_STARS + HNUM * VNUM) \
        + 4 * B * (HNUM * VNUM + META_ROWS * N_STARS)
    return pl.pallas_call(
        _sky_kernel,
        out_shape=(jax.ShapeDtypeStruct((B, HNUM, VNUM), jnp.float32),
                   jax.ShapeDtypeStruct((B, META_ROWS, N_STARS), jnp.float32)),
        grid=(B,),
        in_specs=[pl.BlockSpec(memory_space=pltpu.MemorySpace.SMEM),        # (B, 9) transfers
                  pl.BlockSpec((3, N_STARS), lambda b: (0, 0)),             # stars, VMEM-resident
                  pl.BlockSpec((1, N_STARS), lambda b: (0, 0)),             # mags,  VMEM-resident
                  pl.BlockSpec((HNUM, VNUM), lambda b: (0, 0))],            # Gaussian band matrix
        out_specs=(pl.BlockSpec((None, HNUM, VNUM), lambda b: (b, 0, 0)),   # per-view sky
                   pl.BlockSpec((None, META_ROWS, N_STARS), lambda b: (b, 0, 0))),
        compiler_params=pltpu.CompilerParams(
            dimension_semantics=("parallel",),       # views are independent -> 2 TCs on v7x
            vmem_limit_bytes=8 * 1024 * 1024),
        cost_estimate=pl.CostEstimate(flops=int(flops),
                                      transcendentals=int(B * N_STARS),
                                      bytes_accessed=int(bytes_accessed)),
    )(transfers, stars_t, mags_row, gauss_band)


@jax.jit
def _device_forward(thetas, phis, alphas, stars_t, mags_row):
    transfers = jax.vmap(compute_transfer)(thetas, phis, alphas)            # (B, 3, 3)
    tr = transfers.reshape(transfers.shape[0], 9).astype(jnp.float32)       # (B, 9) -> SMEM
    gauss = jnp.asarray(_GAUSS_BAND)
    return _pallas_render(tr, stars_t, mags_row, gauss)


# --------------------------- host-side get_code ------------------------------
# TODO(synk): dynamic-length boolean-mask gather + sort; done on host per view.
def _get_code_host(filt, ix, iy, mags_flat):
    filt = np.asarray(filt).reshape(-1)
    ixf = np.asarray(ix).reshape(-1).astype(np.float32)
    iyf = np.asarray(iy).reshape(-1).astype(np.float32)
    sel = filt > 0
    n = int(sel.sum())
    if n == 0:
        return np.zeros((1, 3), np.float32)
    mag = mags_flat[sel]
    ang = np.arctan2(ixf - HNUM // 2, iyf - VNUM // 2)[sel]
    dst = np.sqrt(((ixf - HNUM // 2) / HNUM) ** 2 + ((iyf - VNUM // 2) / VNUM) ** 2)[sel]
    idx = int(np.argmax(mag))
    ini = ang[idx:idx + 1]
    ang = np.fmod(ang - ini, 2 * np.pi) / np.pi * 180.0
    ang = ang * (ang >= 0) + (360.0 + ang) * (ang < 0)
    order = np.argsort(ang)
    ang = ang[order].reshape(n, 1)
    mag = (8.0 - 10.0 * mag[order]).reshape(n, 1)
    dst = dst[order].reshape(n, 1)
    init = np.concatenate([np.zeros((1, 1), np.float32),
                           ini.reshape(1, 1).astype(np.float32),
                           np.ones((1, 1), np.float32)], axis=1)
    step = np.concatenate([mag, ang, dst], axis=1).astype(np.float32)
    return np.concatenate([init, step], axis=0).astype(np.float32)


# -------------------------------- forward ------------------------------------
def skyview_forward(thetas, phis, alphas, stars_t, mags_row):
    """Batched Skyview.forward over B views. Returns (sky (B,H,V) device array,
    list of B per-view `code` arrays computed host-side from one bulk D2H copy)."""
    sky, meta = _device_forward(thetas, phis, alphas, stars_t, mags_row)
    meta_np = np.asarray(meta)                                   # single bulk host sync
    mags_np = np.asarray(mags_row).reshape(-1)
    codes = [_get_code_host(meta_np[b, 0],
                            meta_np[b, 1].astype(np.int32),
                            meta_np[b, 2].astype(np.int32),
                            mags_np)
             for b in range(meta_np.shape[0])]
    return sky, codes


if __name__ == "__main__":
    key = jax.random.PRNGKey(0)
    k1, k2, k3, k4 = jax.random.split(key, 4)

    B = 4                                                        # batched views
    # Deterministic synthetic star catalog (stands in for the skyfield/pandas load).
    ras_hours = jax.random.uniform(k1, (N_STARS,), minval=0.0, maxval=24.0)
    decs_rad = jax.random.uniform(k2, (N_STARS,), minval=-np.pi / 2, maxval=np.pi / 2)
    cat_mag = jax.random.uniform(k3, (N_STARS,), minval=0.0, maxval=8.0)
    angles = jax.random.uniform(k4, (3, B), minval=-45.0, maxval=45.0)
    thetas, phis, alphas = angles[0], angles[1], angles[2]

    az = ras_hours * 15.0 / 180.0 * np.pi
    stars_t = jnp.stack([jnp.cos(decs_rad) * jnp.sin(az),        # xyz3 -> self.sphere
                         jnp.cos(decs_rad) * jnp.cos(az),
                         jnp.sin(decs_rad)], axis=0).astype(jnp.float32)         # (3, N)
    mags_row = ((8.0 - cat_mag) / 10.0).reshape(1, N_STARS).astype(jnp.float32)  # (1, N)

    sky, codes = skyview_forward(thetas, phis, alphas, stars_t, mags_row)
    jax.block_until_ready(sky)
    assert sky.shape == (B, HNUM, VNUM) and sky.dtype == jnp.float32
    assert len(codes) == B
    assert all(c.ndim == 2 and c.shape[1] == 3 for c in codes)
    print("KERNEL_OK")
</pallas_src>

<mosaic_0001>
module attributes {stable_mosaic.version = 11 : i64} {
  func.func @_sky_kernel(%arg0: i32, %arg1: memref<4x9xf32, #tpu.memory_space<smem>>, %arg2: memref<3x128xf32, #tpu.memory_space<vmem>>, %arg3: memref<1x128xf32, #tpu.memory_space<vmem>>, %arg4: memref<16x16xf32, #tpu.memory_space<vmem>>, %arg5: memref<1x16x16xf32, #tpu.memory_space<vmem>>, %arg6: memref<1x8x128xf32, #tpu.memory_space<vmem>>) attributes {dimension_semantics = [#tpu.dimension_semantics<parallel>], iteration_bounds = array<i64: 4>, scalar_prefetch = 0 : i64, scratch_operands = 0 : i64, tpu.core_type = #tpu.core_type<tc>, window_params = [{transform_indices = @transform_0, window_bounds = array<i64: 4, 9>}, {pipeline_mode = #tpu.pipeline_mode<synchronous>, transform_indices = @transform_1, window_bounds = array<i64: 3, 128>}, {pipeline_mode = #tpu.pipeline_mode<synchronous>, transform_indices = @transform_2, window_bounds = array<i64: 1, 128>}, {pipeline_mode = #tpu.pipeline_mode<synchronous>, transform_indices = @transform_3, window_bounds = array<i64: 16, 16>}, {transform_indices = @transform_4, window_bounds = array<i64: 1, 16, 16>}, {transform_indices = @transform_5, window_bounds = array<i64: 1, 8, 128>}]} {
    %c0 = arith.constant 0 : index
    %c0_0 = arith.constant 0 : index
    %0 = vector.load %arg2[%c0, %c0_0] : memref<3x128xf32, #tpu.memory_space<vmem>>, vector<3x128xf32>
    %1 = vector.extract_strided_slice %0 {offsets = [0, 0], sizes = [1, 128], strides = [1, 1]} : vector<3x128xf32> to vector<1x128xf32>
    %2 = vector.extract_strided_slice %0 {offsets = [1, 0], sizes = [1, 128], strides = [1, 1]} : vector<3x128xf32> to vector<1x128xf32>
    %3 = vector.extract_strided_slice %0 {offsets = [2, 0], sizes = [1, 128], strides = [1, 1]} : vector<3x128xf32> to vector<1x128xf32>
    %4 = arith.index_cast %arg0 : i32 to index
    %c0_1 = arith.constant 0 : index
    %5 = memref.load %arg1[%4, %c0_1] : memref<4x9xf32, #tpu.memory_space<smem>>
    %6 = vector.broadcast %5 : f32 to vector<1x128xf32>
    %7 = arith.mulf %6, %1 : vector<1x128xf32>
    %8 = arith.index_cast %arg0 : i32 to index
    %c1 = arith.constant 1 : index
    %9 = memref.load %arg1[%8, %c1] : memref<4x9xf32, #tpu.memory_space<smem>>
    %10 = vector.broadcast %9 : f32 to vector<1x128xf32>
    %11 = arith.mulf %10, %2 : vector<1x128xf32>
    %12 = arith.addf %7, %11 : vector<1x128xf32>
    %13 = arith.index_cast %arg0 : i32 to index
    %c2 = arith.constant 2 : index
    %14 = memref.load %arg1[%13, %c2] : memref<4x9xf32, #tpu.memory_space<smem>>
    %15 = vector.broadcast %14 : f32 to vector<1x128xf32>
    %16 = arith.mulf %15, %3 : vector<1x128xf32>
    %17 = arith.addf %12, %16 : vector<1x128xf32>
    %18 = arith.index_cast %arg0 : i32 to index
    %c3 = arith.constant 3 : index
    %19 = memref.load %arg1[%18, %c3] : memref<4x9xf32, #tpu.memory_space<smem>>
    %20 = vector.broadcast %19 : f32 to vector<1x128xf32>
    %21 = arith.mulf %20, %1 : vector<1x128xf32>
    %22 = arith.index_cast %arg0 : i32 to index
    %c4 = arith.constant 4 : index
    %23 = memref.load %arg1[%22, %c4] : memref<4x9xf32, #tpu.memory_space<smem>>
    %24 = vector.broadcast %23 : f32 to vector<1x128xf32>
    %25 = arith.mulf %24, %2 : vector<1x128xf32>
    %26 = arith.addf %21, %25 : vector<1x128xf32>
    %27 = arith.index_cast %arg0 : i32 to index
    %c5 = arith.constant 5 : index
    %28 = memref.load %arg1[%27, %c5] : memref<4x9xf32, #tpu.memory_space<smem>>
    %29 = vector.broadcast %28 : f32 to vector<1x128xf32>
    %30 = arith.mulf %29, %3 : vector<1x128xf32>
    %31 = arith.addf %26, %30 : vector<1x128xf32>
    %32 = arith.index_cast %arg0 : i32 to index
    %c6 = arith.constant 6 : index
    %33 = memref.load %arg1[%32, %c6] : memref<4x9xf32, #tpu.memory_space<smem>>
    %34 = vector.broadcast %33 : f32 to vector<1x128xf32>
    %35 = arith.mulf %34, %1 : vector<1x128xf32>
    %36 = arith.index_cast %arg0 : i32 to index
    %c7 = arith.constant 7 : index
    %37 = memref.load %arg1[%36, %c7] : memref<4x9xf32, #tpu.memory_space<smem>>
    %38 = vector.broadcast %37 : f32 to vector<1x128xf32>
    %39 = arith.mulf %38, %2 : vector<1x128xf32>
    %40 = arith.addf %35, %39 : vector<1x128xf32>
    %41 = arith.index_cast %arg0 : i32 to index
    %c8 = arith.constant 8 : index
    %42 = memref.load %arg1[%41, %c8] : memref<4x9xf32, #tpu.memory_space<smem>>
    %43 = vector.broadcast %42 : f32 to vector<1x128xf32>
    %44 = arith.mulf %43, %3 : vector<1x128xf32>
    %45 = arith.addf %40, %44 : vector<1x128xf32>
    %46 = arith.mulf %17, %17 : vector<1x128xf32>
    %47 = arith.mulf %31, %31 : vector<1x128xf32>
    %48 = arith.addf %46, %47 : vector<1x128xf32>
    %49 = arith.mulf %45, %45 : vector<1x128xf32>
    %50 = arith.addf %48, %49 : vector<1x128xf32>
    %51 = math.rsqrt %50 : vector<1x128xf32>
    %52 = arith.mulf %17, %51 : vector<1x128xf32>
    %53 = arith.mulf %31, %51 : vector<1x128xf32>
    %54 = arith.mulf %45, %51 : vector<1x128xf32>
    %55 = math.absf %53 : vector<1x128xf32>
    %cst = arith.constant 5.000000e-01 : f32
    %56 = vector.broadcast %cst : f32 to vector<1x128xf32>
    %57 = arith.cmpf olt, %55, %56 : vector<1x128xf32>
    %58 = math.absf %54 : vector<1x128xf32>
    %cst_2 = arith.constant 5.000000e-01 : f32
    %59 = vector.broadcast %cst_2 : f32 to vector<1x128xf32>
    %60 = arith.cmpf olt, %58, %59 : vector<1x128xf32>
    %61 = arith.andi %57, %60 : vector<1x128xi1>
    %cst_3 = arith.constant 0.000000e+00 : f32
    %62 = vector.broadcast %cst_3 : f32 to vector<1x128xf32>
    %63 = arith.cmpf ogt, %52, %62 : vector<1x128xf32>
    %64 = arith.andi %61, %63 : vector<1x128xi1>
    %65 = arith.extui %64 : vector<1x128xi1> to vector<1x128xi32>
    %66 = arith.sitofp %65 : vector<1x128xi32> to vector<1x128xf32>
    %cst_4 = arith.constant 5.000000e-01 : f32
    %67 = vector.broadcast %cst_4 : f32 to vector<1x128xf32>
    %68 = arith.divf %53, %67 : vector<1x128xf32>
    %cst_5 = arith.constant 0.000000e+00 : f32
    %69 = vector.broadcast %cst_5 : f32 to vector<1x128xf32>
    %70 = arith.cmpf oge, %68, %69 : vector<1x128xf32>
    %71 = math.floor %68 : vector<1x128xf32>
    %72 = math.ceil %68 : vector<1x128xf32>
    %73 = arith.select %70, %71, %72 : vector<1x128xi1>, vector<1x128xf32>
    %74 = arith.subf %68, %73 : vector<1x128xf32>
    %cst_6 = arith.constant 8.000000e+00 : f32
    %75 = vector.broadcast %cst_6 : f32 to vector<1x128xf32>
    %76 = arith.mulf %75, %74 : vector<1x128xf32>
    %cst_7 = arith.constant 8.000000e+00 : f32
    %77 = vector.broadcast %cst_7 : f32 to vector<1x128xf32>
    %78 = arith.addf %77, %76 : vector<1x128xf32>
    %79 = arith.fptosi %78 : vector<1x128xf32> to vector<1x128xi32>
    %cst_8 = arith.constant 5.000000e-01 : f32
    %80 = vector.broadcast %cst_8 : f32 to vector<1x128xf32>
    %81 = arith.divf %54, %80 : vector<1x128xf32>
    %cst_9 = arith.constant 0.000000e+00 : f32
    %82 = vector.broadcast %cst_9 : f32 to vector<1x128xf32>
    %83 = arith.cmpf oge, %81, %82 : vector<1x128xf32>
    %84 = math.floor %81 : vector<1x128xf32>
    %85 = math.ceil %81 : vector<1x128xf32>
    %86 = arith.select %83, %84, %85 : vector<1x128xi1>, vector<1x128xf32>
    %87 = arith.subf %81, %86 : vector<1x128xf32>
    %cst_10 = arith.constant 8.000000e+00 : f32
    %88 = vector.broadcast %cst_10 : f32 to vector<1x128xf32>
    %89 = arith.mulf %88, %87 : vector<1x128xf32>
    %cst_11 = arith.constant 8.000000e+00 : f32
    %90 = vector.broadcast %cst_11 : f32 to vector<1x128xf32>
    %91 = arith.addf %90, %89 : vector<1x128xf32>
    %92 = arith.fptosi %91 : vector<1x128xf32> to vector<1x128xi32>
    %c0_i32 = arith.constant 0 : i32
    %c15_i32 = arith.constant 15 : i32
    %93 = vector.broadcast %c0_i32 : i32 to vector<1x128xi32>
    %94 = arith.maxsi %93, %79 : vector<1x128xi32>
    %95 = vector.broadcast %c15_i32 : i32 to vector<1x128xi32>
    %96 = arith.minsi %95, %94 : vector<1x128xi32>
    %c0_i32_12 = arith.constant 0 : i32
    %c15_i32_13 = arith.constant 15 : i32
    %97 = vector.broadcast %c0_i32_12 : i32 to vector<1x128xi32>
    %98 = arith.maxsi %97, %92 : vector<1x128xi32>
    %99 = vector.broadcast %c15_i32_13 : i32 to vector<1x128xi32>
    %100 = arith.minsi %99, %98 : vector<1x128xi32>
    %101 = arith.sitofp %96 : vector<1x128xi32> to vector<1x128xf32>
    %102 = arith.sitofp %100 : vector<1x128xi32> to vector<1x128xf32>
    %cst_14 = arith.constant 0.000000e+00 : f32
    %103 = vector.broadcast %cst_14 : f32 to vector<5x128xf32>
    %104 = tpu.concatenate %66, %101, %102, %103 in 0 : vector<1x128xf32>, vector<1x128xf32>, vector<1x128xf32>, vector<5x128xf32> -> vector<8x128xf32>
    %c0_15 = arith.constant 0 : index
    %c0_16 = arith.constant 0 : index
    %c0_17 = arith.constant 0 : index
    %105 = vector.load %arg6[%c0_15, %c0_16, %c0_17] : memref<1x8x128xf32, #tpu.memory_space<vmem>>, vector<1x8x128xf32>
    %106 = vector.shape_cast %105 : vector<1x8x128xf32> to vector<8x128xf32>
    %107 = vector.shape_cast %104 : vector<8x128xf32> to vector<1x8x128xf32>
    tpu.vector_store %arg6[%c0_15, %c0_16, %c0_17], %107 {strides = array<i32>} : memref<1x8x128xf32, #tpu.memory_space<vmem>>, vector<1x8x128xf32>,
    %108 = tpu.iota {dimensions = array<i32: 1>} : vector<1x128xi32>
    %c16_i32 = arith.constant 16 : i32
    %109 = vector.broadcast %c16_i32 : i32 to vector<1x128xi32>
    %110 = arith.muli %96, %109 : vector<1x128xi32>
    %111 = arith.addi %110, %100 : vector<1x128xi32>
    %112 = tpu.iota {dimensions = array<i32: 0>} : vector<256x128xi32>
    %113 = vector.broadcast %111 : vector<1x128xi32> to vector<256x128xi32>
    %114 = arith.cmpi eq, %112, %113 : vector<256x128xi32>
    %c1_i32 = arith.constant 1 : i32
    %115 = vector.broadcast %c1_i32 : i32 to vector<1x128xi32>
    %116 = arith.addi %108, %115 : vector<1x128xi32>
    %c0_i32_18 = arith.constant 0 : i32
    %117 = vector.shape_cast %116 : vector<1x128xi32> to vector<1x128xi32>
    %118 = vector.broadcast %117 : vector<1x128xi32> to vector<256x128xi32>
    %119 = vector.broadcast %c0_i32_18 : i32 to vector<256x128xi32>
    %120 = arith.select %114, %118, %119 : vector<256x128xi1>, vector<256x128xi32>
    %cst_19 = arith.constant dense<-2147483648> : vector<256xi32>
    %121 = vector.multi_reduction <maxsi>, %120, %cst_19 [1] : vector<256x128xi32> to vector<256xi32>
    %122 = vector.shape_cast %121 : vector<256xi32> to vector<256x1xi32>
    %c0_i32_20 = arith.constant 0 : i32
    %123 = vector.shape_cast %122 : vector<256x1xi32> to vector<256x1xi32>
    %124 = vector.broadcast %123 : vector<256x1xi32> to vector<256x128xi32>
    %125 = vector.broadcast %c0_i32_20 : i32 to vector<256x128xi32>
    %126 = arith.select %114, %124, %125 : vector<256x128xi1>, vector<256x128xi32>
    %cst_21 = arith.constant dense<0> : vector<128xi32>
    %127 = vector.multi_reduction <add>, %126, %cst_21 [0] : vector<256x128xi32> to vector<128xi32>
    %128 = vector.shape_cast %127 : vector<128xi32> to vector<1x128xi32>
    %c1_i32_22 = arith.constant 1 : i32
    %129 = vector.broadcast %c1_i32_22 : i32 to vector<1x128xi32>
    %130 = arith.addi %108, %129 : vector<1x128xi32>
    %131 = arith.cmpi eq, %128, %130 : vector<1x128xi32>
    %132 = arith.extui %131 : vector<1x128xi1> to vector<1x128xi32>
    %133 = arith.sitofp %132 : vector<1x128xi32> to vector<1x128xf32>
    %c0_23 = arith.constant 0 : index
    %c0_24 = arith.constant 0 : index
    %134 = vector.load %arg3[%c0_23, %c0_24] : memref<1x128xf32, #tpu.memory_space<vmem>>, vector<1x128xf32>
    %135 = arith.mulf %66, %134 : vector<1x128xf32>
    %136 = arith.mulf %135, %133 : vector<1x128xf32>
    %137 = tpu.iota {dimensions = array<i32: 0>} : vector<16x128xi32>
    %138 = vector.broadcast %96 : vector<1x128xi32> to vector<16x128xi32>
    %139 = arith.cmpi eq, %137, %138 : vector<16x128xi32>
    %140 = arith.extui %139 : vector<16x128xi1> to vector<16x128xi32>
    %141 = arith.sitofp %140 : vector<16x128xi32> to vector<16x128xf32>
    %142 = tpu.iota {dimensions = array<i32: 0>} : vector<16x128xi32>
    %143 = vector.broadcast %100 : vector<1x128xi32> to vector<16x128xi32>
    %144 = arith.cmpi eq, %142, %143 : vector<16x128xi32>
    %145 = arith.extui %144 : vector<16x128xi1> to vector<16x128xi32>
    %146 = arith.sitofp %145 : vector<16x128xi32> to vector<16x128xf32>
    %147 = vector.broadcast %136 : vector<1x128xf32> to vector<16x128xf32>
    %148 = arith.mulf %141, %147 : vector<16x128xf32>
    %cst_25 = arith.constant dense<0.000000e+00> : vector<16x16xf32>
    %149 = tpu.matmul %148, %146, %cst_25 {dimension_numbers = #tpu.dot_dimension_numbers<[1], [1], [0], [0], [0, 0, 1, 0], [], []>} : vector<16x128xf32>, vector<16x128xf32>, vector<16x16xf32> -> vector<16x16xf32>
    %c0_26 = arith.constant 0 : index
    %c0_27 = arith.constant 0 : index
    %150 = vector.load %arg4[%c0_26, %c0_27] : memref<16x16xf32, #tpu.memory_space<vmem>>, vector<16x16xf32>
    %cst_28 = arith.constant dense<0.000000e+00> : vector<16x16xf32>
    %151 = tpu.matmul %150, %149, %cst_28 {dimension_numbers = #tpu.dot_dimension_numbers<[1], [0], [0], [1], [0, 0, 1, 1], [], []>} : vector<16x16xf32>, vector<16x16xf32>, vector<16x16xf32> -> vector<16x16xf32>
    %cst_29 = arith.constant dense<0.000000e+00> : vector<16x16xf32>
    %152 = tpu.matmul %151, %150, %cst_29 {dimension_numbers = #tpu.dot_dimension_numbers<[1], [0], [0], [1], [0, 0, 1, 1], [], []>} : vector<16x16xf32>, vector<16x16xf32>, vector<16x16xf32> -> vector<16x16xf32>
    %c0_30 = arith.constant 0 : index
    %c0_31 = arith.constant 0 : index
    %c0_32 = arith.constant 0 : index
    %153 = vector.load %arg5[%c0_30, %c0_31, %c0_32] : memref<1x16x16xf32, #tpu.memory_space<vmem>>, vector<1x16x16xf32>
    %154 = vector.shape_cast %153 : vector<1x16x16xf32> to vector<16x16xf32>
    %155 = vector.shape_cast %152 : vector<16x16xf32> to vector<1x16x16xf32>
    tpu.vector_store %arg5[%c0_30, %c0_31, %c0_32], %155 {strides = array<i32>} : memref<1x16x16xf32, #tpu.memory_space<vmem>>, vector<1x16x16xf32>,
    return
  }
  func.func @transform_0(%arg0: i32) -> (i32, i32) {
    %c0_i32 = arith.constant 0 : i32
    %c0_i32_0 = arith.constant 0 : i32
    %c0_i32_1 = arith.constant 0 : i32
    return %c0_i32, %c0_i32_0 : i32, i32
  }
  func.func @transform_1(%arg0: i32) -> (i32, i32) {
    %c0_i32 = arith.constant 0 : i32
    %c0_i32_0 = arith.constant 0 : i32
    %c0_i32_1 = arith.constant 0 : i32
    return %c0_i32, %c0_i32_0 : i32, i32
  }
  func.func @transform_2(%arg0: i32) -> (i32, i32) {
    %c0_i32 = arith.constant 0 : i32
    %c0_i32_0 = arith.constant 0 : i32
    %c0_i32_1 = arith.constant 0 : i32
    return %c0_i32, %c0_i32_0 : i32, i32
  }
  func.func @transform_3(%arg0: i32) -> (i32, i32) {
    %c0_i32 = arith.constant 0 : i32
    %c0_i32_0 = arith.constant 0 : i32
    %c0_i32_1 = arith.constant 0 : i32
    return %c0_i32, %c0_i32_0 : i32, i32
  }
  func.func @transform_4(%arg0: i32) -> (i32, i32, i32) {
    %c0_i32 = arith.constant 0 : i32
    %c0_i32_0 = arith.constant 0 : i32
    %c0_i32_1 = arith.constant 0 : i32
    return %arg0, %c0_i32, %c0_i32_0 : i32, i32, i32
  }
  func.func @transform_5(%arg0: i32) -> (i32, i32, i32) {
    %c0_i32 = arith.constant 0 : i32
    %c0_i32_0 = arith.constant 0 : i32
    %c0_i32_1 = arith.constant 0 : i32
    return %arg0, %c0_i32, %c0_i32_0 : i32, i32, i32
  }
}

</mosaic_0001>

<bundles_post_ra>
// kernel: _device_forward.1
= control target key start
LH: loop header
LB: loop body
LE: loop exit
PB: predicated region body
PF: predicated region fallthrough
CT: control target
= control target key end

     0   :  { %s2623_s0 = inlined_call_operand.vmem [shape: f32[4,9], index: 0, kind: input, shape index: {}]   ;;  %s2624_s1 = inlined_call_operand.vmem [shape: f32[3,128], index: 1, kind: input, shape index: {}]   ;;  %s2625_s2 = inlined_call_operand.vmem [shape: f32[1,128], index: 2, kind: input, shape index: {}]   ;;  %s2626_s3 = inlined_call_operand.vmem [shape: f32[16,16], index: 3, kind: input, shape index: {}]   ;;  %s2627_s4 = inlined_call_operand.hbm [shape: f32[4,16,16], index: 4, kind: output, shape index: {0}]   ;;  %s2628_s5 = inlined_call_operand.hbm [shape: f32[4,8,128], index: 5, kind: output, shape index: {1}]  }
   0x1   :  { %2707 = sst [smem:[#allocation64_spill]] %s2623_s0 }
   0x2   :  { %11 = vsyncpa [#allocation4], 0 }
   0x3   :  { %12 = vsyncpa [#allocation3], 0 }
   0x4   :  { %14 = vsyncpa [#allocation3 + $0x1], 0 }
   0x5   :  { %15 = vsyncpa [#allocation7], 0 }
   0x6   :  { %17 = vsyncpa [#allocation7 + $0x1], 0  ;;  %s1646_s18 = smov 0   ;;  %s1648_s19 = smov 0  }
   0x7   :  { %s1650_s20 = smov 0   ;;  %s1652_s21 = smov 0  }
   0x8 LB: > { %s1667_s22 = sadd.s32 4294967295, %s1607_s21   ;;  %s1372_s23 = sadd.s32 4294967294, %s1607_s21   ;;  %s1607_s21 = sphi %s1652_s21, %s2841_s21   ;;  %s1603_s20 = sphi %s1650_s20, %s2840_s20   ;;  %s1599_s19 = sphi %s1648_s19, %s2839_s19   ;;  %s1595_s18 = sphi %s1646_s18, %s2838_s18  }
   0x9   : > { %s1671_s24 = sadd.s32 1, %s1607_s21   ;;  %s114_s25 = sadd.s32 1, %s1603_s20 }
   0xa   : > { %s111_s26 = ssub.s32 %s1607_s21, %s1671_s24  ;;  %p124_p0 = scmp.ne.s32.totalorder %s1603_s20, %s1599_s19 }
   0xb   : > { %p112_p1 = scmp.eq.s32.totalorder %s111_s26, 0  ;;  %p125_p2 = scmp.eq.s32.totalorder %s1667_s22, 3 }
   0xc   : > { %p130_p3 = scmp.ne.s32.totalorder %s1599_s19, %s1595_s18  ;;  %p131_p4 = scmp.eq.s32.totalorder %s1372_s23, 3 }
   0xd   : > { %s1682_s27 = scalar_select %p112_p1, %s1603_s20, %s114_s25  }
   0xe   : > { %p1684_p5 = por %p125_p2, %p124_p0  ;;  %p1688_p6 = por %p131_p4, %p130_p3 }
   0xf   : > { %2708 = sst [smem:[#allocation11_spill]] %s1682_s27  ;;  %p1373_p7 = scmp.ge.s32.totalorder %s1607_s21, 1 }
  0x10   : > { %p164_p8 = scmp.lt.s32.totalorder %s1607_s21, 5  ;;  %p1456_p9 = scmp.eq.s32.totalorder %s1667_s22, 0 }
  0x11   : > { %s2712_s0 = sld [smem:[#allocation64_spill]] }
  0x12   : > { %p1695_p10 = pnand %p1373_p7, %p164_p8 }
  0x14   : > { %p1445_p11 = pneg %p1695_p10 }
  0x16   : > { %p1446_p12 = pnand %p1456_p9, %p1445_p11 }
  0x17   : > { %s177_s8 = sshll.u32 %s2712_s0, 4  ;;  %s178_s8 = int_to_ptr.vmem [resolvable:$true] %s177_s8 }
  0x18   : > { %s1498_s9 = scalar_lea.vmem %s178_s8, 64  ;;  %p1500_p0 = pneg %p1446_p12 }
  0x19   : > { %p1499_p13 = scmp.ne.s32.totalorder %s178_s8, %s1498_s9  ;;  %p1506_p3 = scmp.lt.s32.totalorder %s178_s8, %s178_s8 }
  0x1a   : > { %p1507_p4 = scmp.lt.s32.totalorder %s1498_s9, %s1498_s9 }
  0x1b   : > { %p1501_p1 = pnand %p1500_p0, %p1499_p13 }
  0x1c   : > { %p1508_p7 = por %p1507_p4, %p1506_p3 }
  0x1d   : > { %p1502_p2 = pneg %p1501_p1 }
  0x1f   : > { %p1509_p8 = pnand %p1508_p7, %p1502_p2 }
  0x21   : > { %1512 = shalt.err (!%p1509_p8)
}
  0x22   : > { %s1609_s10 = smov [#allocation2]   ;;  %199 = sbr.rel (%p1695_p10) target bundleno = 1092 (0x444), region = 36 }
  0x23   : > { %1448 = dma.vmem_to_smem (!%p1446_p12), %s178_s8, 64, %s1609_s10, [#allocation4]  }
  0x27   : > { %1582 = dma.done.wait (%p1456_p9), [#allocation4], 64  }
  0x28   : > { %1584 = vsyncadd (%p1456_p9), [#allocation4], 4294967232 }
  0x29   : > { %205 = sfence }
  0x2a   : > { %s1713_s11 = sshll.u32 %s1667_s22, 7  ;;  %v228_v0 = vld [vmem:[%s2624_s1] sm:$0x7]  ;;  %v349_v54 = vlaneseq }
  0x2b   : > { %s230_s12 = sld [smem:[#allocation2 + %s1713_s11]]  ;;  %s233_s13 = sadd.s32 1, %s1713_s11 }
  0x2c   : > { %s234_s14 = sld [smem:[#allocation2 + %s233_s13]]  ;;  %s241_s15 = sadd.s32 2, %s1713_s11  ;;  %v1741_v58 = vshrl.u32 %v349_v54, 7  ;;  %v350_v62 = vand.u32 127, %v349_v54 }
  0x2d   : > { %s242_s16 = sld [smem:[#allocation2 + %s241_s15]]  ;;  %s249_s17 = sadd.s32 3, %s1713_s11 }
  0x2e   : > { %s250_s23 = sld [smem:[#allocation2 + %s249_s17]]  ;;  %s253_s25 = sadd.s32 4, %s1713_s11  ;;  %2717 = vst [vmem:[#allocation16_spill] sm:$0xff] %v1741_v58 }
  0x2f   : > { %s254_s26 = sld [smem:[#allocation2 + %s253_s25]]  ;;  %s261_s30 = sadd.s32 5, %s1713_s11 }
  0x30   : > { %s262_s8 = sld [smem:[#allocation2 + %s261_s30]]  ;;  %s269_s9 = sadd.s32 6, %s1713_s11 }
  0x31   : > { %v231_v1 = vstv %s230_s12  ;;  %s270_s10 = sld [smem:[#allocation2 + %s269_s9]]  ;;  %s273_s0 = sadd.s32 7, %s1713_s11 }
  0x32   : > { %v235_v2 = vstv %s234_s14  ;;  %s274_s27 = sld [smem:[#allocation2 + %s273_s0]]  ;;  %s281_s13 = sadd.s32 8, %s1713_s11  ;;  %v232_v3 = vmul.f32 %v231_v1, %v228_v0  ;;  %v1749_v1 = vsub.s32 0, %v1741_v58 }
  0x33   : > { %v236_v4 = vmul.f32 %v235_v2, %v228_v0  ;;  %v243_v5 = vstv %s242_s16  ;;  %s282_s15 = sld [smem:[#allocation2 + %s281_s13]]  ;;  %s1279_s7 = scalar_lea.hbm %s2628_s5, %s1713_s11 }
  0x34   : > { %v244_v6 = vmul.f32 %v243_v5, %v228_v0  ;;  %v251_v7 = vstv %s250_s23  ;;  %2720 = vst [vmem:[#allocation19_spill] sm:$0xff] %v1749_v1  ;;  %v1759_v5 = vadd.s32 24, %v1741_v58  ;;  %s2551_s23 = sand.u32 1, %s1599_s19   ;;  %s1612_s13 = smov [#allocation6]  }
  0x35   : > { %v238_v8 = vrot.slane %v236_v4, 1  ;;  %v255_v9 = vstv %s254_s26  ;;  %v252_v11 = vmul.f32 %v251_v7, %v228_v0  ;;  %v1756_v4 = vadd.s32 8, %v1741_v58  ;;  %s1378_s25 = sshll.u32 %s2551_s23, 3  ;;  %s1252_s9 = scalar_lea.sflag [#allocation7], %s2551_s23 }
  0x36   : > { %v246_v10 = vrot.slane %v244_v6, 2  ;;  %v256_v12 = vmul.f32 %v255_v9, %v228_v0  ;;  %v263_v13 = vstv %s262_s8  ;;  %2723 = vst [vmem:[#allocation22_spill] sm:$0xff] %v1759_v5  ;;  %v1761_v6 = vadd.s32 1, %v350_v62  ;;  %s227_s26 = scalar_lea.vmem [#allocation6], %s1378_s25 }
  0x37   : > { %v240_v14 = vadd.f32 %v238_v8, %v232_v3  ;;  %v264_v15 = vmul.f32 %v263_v13, %v228_v0  ;;  %v271_v16 = vstv %s270_s10  ;;  %v1753_v3 = vadd.s32 16, %v1741_v58  ;;  %2722 = vst [vmem:[#allocation21_spill] sm:$0xff] %v1756_v4  ;;  %s1281_s8 = sshll.u32 %s227_s26, 4  ;;  %s1282_s8 = int_to_ptr.vmem [resolvable:$true] %s1281_s8 }
  0x38   : > { %v258_v17 = vrot.slane %v256_v12, 1  ;;  %v272_v18 = vmul.f32 %v271_v16, %v228_v0  ;;  %v275_v19 = vstv %s274_s27  ;;  %2724 = vst [vmem:[#allocation23_spill] sm:$0xff] %v1761_v6  ;;  %v1767_v8 = vadd.s32 32, %v1741_v58  ;;  %s1513_s10 = scalar_lea.vmem %s1282_s8, 128 }
  0x39   : > { %v1727_v20 = vadd.f32 %v246_v10, %v240_v14  ;;  %v266_v21 = vrot.slane %v264_v15, 2  ;;  %v276_v22 = vmul.f32 %v275_v19, %v228_v0  ;;  %v283_v23 = vstv %s282_s15  ;;  %2721 = vst [vmem:[#allocation20_spill] sm:$0xff] %v1753_v3  ;;  %p1514_p9 = scmp.ne.s32.totalorder %s1282_s8, %s1513_s10  ;;  %s1517_s15 = sshll.u32 %s1612_s13, 4  ;;  %s1518_s15 = int_to_ptr.vmem [resolvable:$false] %s1517_s15 }
  0x3a   : > { %v260_v24 = vadd.f32 %v258_v17, %v252_v11  ;;  %v284_v25 = vmul.f32 %v283_v23, %v228_v0  ;;  %2726 = vst [vmem:[#allocation25_spill] sm:$0xff] %v1767_v8  ;;  %v1770_v9 = vadd.s32 40, %v1741_v58  ;;  %v1773_v10 = vadd.s32 48, %v1741_v58  ;;  %s1519_s0 = scalar_lea.vmem %s1518_s15, 256  ;;  %p1520_p12 = scmp.lt.s32.totalorder %s1282_s8, %s1518_s15 }
  0x3b   : > { %2713 = vst [vmem:[#allocation12_spill] sm:$0xff] %v1727_v20  ;;  %v278_v26 = vrot.slane %v276_v22, 1  ;;  %v289_v29 = vmul.f32 %v1727_v20, %v1727_v20  ;;  %v1776_v11 = vadd.s32 56, %v1741_v58  ;;  %v1822_v22 = vadd.s32 72, %v1741_v58  ;;  %p1515_p10 = pnand %p1514_p9, %p1684_p5  ;;  %p1521_p13 = scmp.lt.s32.totalorder %s1519_s0, %s1513_s10 }
  0x3c   : > { %v268_v27 = vadd.f32 %v266_v21, %v260_v24  ;;  %v286_v28 = vrot.slane %v284_v25, 2  ;;  %2727 = vst [vmem:[#allocation26_spill] sm:$0xff] %v1770_v9  ;;  %2728 = vst [vmem:[#allocation27_spill] sm:$0xff] %v1773_v10  ;;  %v1819_v21 = vadd.s32 64, %v1741_v58  ;;  %v1959_v62 = vadd.s32 128, %v1741_v58 }
  0x3d   : > { %v280_v30 = vadd.f32 %v278_v26, %v272_v18  ;;  %2729 = vst [vmem:[#allocation28_spill] sm:$0xff] %v1776_v11  ;;  %2731 = vst [vmem:[#allocation30_spill] sm:$0xff] %v1822_v22  ;;  %p1516_p11 = pneg %p1515_p10  ;;  %p1522_p0 = por %p1521_p13, %p1520_p12 }
  0x3e   : > { %v290_v31 = vmul.f32 %v268_v27, %v268_v27  ;;  %2730 = vst [vmem:[#allocation29_spill] sm:$0xff] %v1819_v21  ;;  %2738 = vst [vmem:[#allocation37_spill] sm:$0xff] %v1959_v62 }
  0x3f   : > { %v288_v32 = vadd.f32 %v286_v28, %v280_v30  ;;  %p1523_p1 = pnand %p1522_p0, %p1516_p11 }
  0x40   : > { %v291_v33 = vadd.f32 %v290_v31, %v289_v29 }
  0x41   : > { %v292_v34 = vmul.f32 %v288_v32, %v288_v32 }
  0x43   : > { %v293_v35 = vadd.f32 %v292_v34, %v291_v33  ;;  %v1869_v33 = vadd.s32 80, %v1741_v58  ;;  %v1872_v34 = vadd.s32 88, %v1741_v58 }
  0x45   : > { %1496 = vrsqrt.f32 %v293_v35  ;;  %2732 = vst [vmem:[#allocation31_spill] sm:$0xff] %v1869_v33  ;;  %2733 = vst [vmem:[#allocation32_spill] sm:$0xff] %v1872_v34 }
  0x52   : > { %v1731_v36 = vpop.eup %1496 }
  0x53   : > { %2714 = vst [vmem:[#allocation13_spill] sm:$0xff] %v1731_v36  ;;  %v1734_v37 = vmul.f32 %v1731_v36, %v268_v27  ;;  %v1737_v38 = vmul.f32 %v1731_v36, %v288_v32 }
  0x55   : > { %2715 = vst [vmem:[#allocation14_spill] sm:$0xff] %v1734_v37  ;;  %2716 = vst [vmem:[#allocation15_spill] sm:$0xff] %v1737_v38  ;;  %v308_v39 = vmul.f32 2.0, %v1734_v37  ;;  %v317_v40 = vmul.f32 2.0, %v1737_v38 }
  0x57   : > { %vm309_vm0 = vcmp.ge.f32.partialorder %v308_v39, 0.0  ;;  %v310_v41 = vfloor.f32 %v308_v39  ;;  %v311_v42 = vceil.f32 %v308_v39  ;;  %vm318_vm1 = vcmp.ge.f32.partialorder %v317_v40, 0.0 }
  0x58   : > { %v319_v43 = vfloor.f32 %v317_v40  ;;  %v320_v44 = vceil.f32 %v317_v40 }
  0x59   : > { %v312_v45 = vsel %vm309_vm0, %v310_v41, %v311_v42 }
  0x5a   : > { %v313_v46 = vsub.f32 %v308_v39, %v312_v45  ;;  %v321_v47 = vsel %vm318_vm1, %v319_v43, %v320_v44  ;;  %v1899_v44 = vadd.s32 96, %v1741_v58  ;;  %v1902_v45 = vadd.s32 104, %v1741_v58 }
  0x5b   : > { %v322_v48 = vsub.f32 %v317_v40, %v321_v47 }
  0x5c   : > { %v314_v49 = vmul.f32 8.0, %v313_v46  ;;  %2734 = vst [vmem:[#allocation33_spill] sm:$0xff] %v1899_v44  ;;  %2735 = vst [vmem:[#allocation34_spill] sm:$0xff] %v1902_v45 }
  0x5d   : > { %v323_v50 = vmul.f32 8.0, %v322_v48 }
  0x5e   : > { %v315_v51 = vadd.f32 8.0, %v314_v49 }
  0x5f   : > { %v324_v52 = vadd.f32 8.0, %v323_v50 }
  0x60   : > { %v1433_v53 = vtrunc.f32 %v315_v51 }
  0x61   : > { %v1435_v55 = vtrunc.f32 %v324_v52  ;;  %v1929_v52 = vadd.s32 112, %v1741_v58 }
  0x62   : > { %v1434_v56 = vcvt.f32.s32 %v1433_v53  ;;  %v1932_v53 = vadd.s32 120, %v1741_v58 }
  0x63   : > { %v1436_v57 = vcvt.f32.s32 %v1435_v55  ;;  %2736 = vst [vmem:[#allocation35_spill] sm:$0xff] %v1929_v52 }
  0x64   : > { %vm326_vm2 = vcmp.gt.s32.totalorder %v1434_v56, 0  ;;  %2737 = vst [vmem:[#allocation36_spill] sm:$0xff] %v1932_v53 }
  0x65   : > { %v327_v59 = vsel %vm326_vm2, %v1434_v56, 0  ;;  %vm330_vm3 = vcmp.gt.s32.totalorder %v1436_v57, 0 }
  0x66   : > { %vm328_vm4 = vcmp.lt.s32.totalorder %v327_v59, 15  ;;  %v331_v60 = vsel %vm330_vm3, %v1436_v57, 0 }
  0x67   : > { %v1743_v61 = vsel %vm328_vm4, %v327_v59, 15  ;;  %vm332_vm5 = vcmp.lt.s32.totalorder %v331_v60, 15 }
  0x68   : > { %2718 = vst [vmem:[#allocation17_spill] sm:$0xff] %v1743_v61  ;;  %v1745_v63 = vsel %vm332_vm5, %v331_v60, 15  ;;  %v351_v0 = vmul.u32 16, %v1743_v61 }
  0x69   : > { %2719 = vst [vmem:[#allocation18_spill] sm:$0xff] %v1745_v63 }
  0x6a   : > { %v352_v2 = vadd.s32 %v351_v0, %v1745_v63  ;;  %v1962_v0 = vadd.s32 136, %v1741_v58 }
  0x6c   : > { %v1764_v7 = vrot.slane %v352_v2, %v1749_v1  ;;  %2739 = vst [vmem:[#allocation38_spill] sm:$0xff] %v1962_v0 }
  0x6e   : > { %2725 = vst [vmem:[#allocation24_spill] sm:$0xff] %v1764_v7  ;;  %vm390_vm6 = vcmp.eq.s32.totalorder %v1741_v58, %v1764_v7  ;;  %vm392_vm7 = vcmp.eq.s32.totalorder %v1753_v3, %v1764_v7  ;;  %vm391_vm8 = vcmp.eq.s32.totalorder %v1756_v4, %v1764_v7  ;;  %vm393_vm9 = vcmp.eq.s32.totalorder %v1759_v5, %v1764_v7 }
  0x6f   : > { %v1790_v12 = vsel %vm390_vm6, %v1761_v6, 0  ;;  %v1796_v13 = vsel %vm392_vm7, %v1761_v6, 0  ;;  %v1802_v14 = vsel %vm391_vm8, %v1761_v6, 0  ;;  %v1808_v15 = vsel %vm393_vm9, %v1761_v6, 0 }
  0x70   : > { %v456_v16 = vshra.s32 %v1790_v12, 16  ;;  %v484_v17 = vshra.s32 %v1796_v13, 16  ;;  %v470_v18 = vshra.s32 %v1802_v14, 16  ;;  %v498_v19 = vshra.s32 %v1808_v15, 16 }
  0x71   : > { %vm394_vm10 = vcmp.eq.s32.totalorder %v1767_v8, %v1764_v7  ;;  %vm395_vm11 = vcmp.eq.s32.totalorder %v1770_v9, %v1764_v7  ;;  %vm396_vm12 = vcmp.eq.s32.totalorder %v1773_v10, %v1764_v7  ;;  %vm397_vm13 = vcmp.eq.s32.totalorder %v1776_v11, %v1764_v7 }
  0x72   : > { %v1824_v23 = vcvt.s32.f32 %v456_v16  ;;  %v1826_v24 = vcvt.s32.f32 %v484_v17  ;;  %v1836_v25 = vsel %vm394_vm10, %v1761_v6, 0  ;;  %v1842_v26 = vsel %vm395_vm11, %v1761_v6, 0 }
  0x73   : > { %v1846_v27 = vcvt.s32.f32 %v470_v18  ;;  %v1848_v28 = vcvt.s32.f32 %v498_v19  ;;  %v512_v29 = vshra.s32 %v1836_v25, 16  ;;  %v526_v30 = vshra.s32 %v1842_v26, 16 }
  0x74   : > { %459 = vmax.xlane.f32.xlu0 %v1824_v23  ;;  %487 = vmax.xlane.f32.xlu1 %v1826_v24  ;;  %v1856_v31 = vsel %vm396_vm12, %v1761_v6, 0  ;;  %v1862_v32 = vsel %vm397_vm13, %v1761_v6, 0  ;;  %vm398_vm14 = vcmp.eq.s32.totalorder %v1819_v21, %v1764_v7  ;;  %vm399_vm15 = vcmp.eq.s32.totalorder %v1822_v22, %v1764_v7 }
  0x75   : > { %v1876_v35 = vcvt.s32.f32 %v512_v29  ;;  %v1878_v39 = vcvt.s32.f32 %v526_v30  ;;  %v540_v40 = vshra.s32 %v1856_v31, 16  ;;  %v554_v41 = vshra.s32 %v1862_v32, 16 }
  0x76   : > { %v1886_v42 = vsel %vm398_vm14, %v1761_v6, 0  ;;  %v1892_v43 = vsel %vm399_vm15, %v1761_v6, 0  ;;  %vm400_vm0 = vcmp.eq.s32.totalorder %v1869_v33, %v1764_v7  ;;  %vm401_vm1 = vcmp.eq.s32.totalorder %v1872_v34, %v1764_v7 }
  0x77   : > { %v1906_v46 = vcvt.s32.f32 %v540_v40  ;;  %v1908_v47 = vcvt.s32.f32 %v554_v41  ;;  %v568_v48 = vshra.s32 %v1886_v42, 16  ;;  %v582_v49 = vshra.s32 %v1892_v43, 16 }
  0x78   : > { %473 = vmax.xlane.f32.xlu0 %v1846_v27  ;;  %501 = vmax.xlane.f32.xlu1 %v1848_v28  ;;  %v1916_v50 = vsel %vm400_vm0, %v1761_v6, 0  ;;  %v1922_v51 = vsel %vm401_vm1, %v1761_v6, 0  ;;  %vm2630_vm2 = vcmp.eq.s32.totalorder %v1899_v44, %v1764_v7  ;;  %vm2629_vm3 = vcmp.eq.s32.totalorder %v1902_v45, %v1764_v7 }
  0x79   : > { %v1936_v54 = vcvt.s32.f32 %v568_v48  ;;  %v1938_v55 = vcvt.s32.f32 %v582_v49  ;;  %v596_v56 = vshra.s32 %v1916_v50, 16  ;;  %v610_v57 = vshra.s32 %v1922_v51, 16 }
  0x7a   : > { %v1946_v59 = vsel %vm2630_vm2, %v1761_v6, 0  ;;  %v1952_v60 = vsel %vm2629_vm3, %v1761_v6, 0  ;;  %vm2634_vm4 = vcmp.eq.s32.totalorder %v1929_v52, %v1764_v7  ;;  %vm2633_vm5 = vcmp.eq.s32.totalorder %v1932_v53, %v1764_v7 }
  0x7b   : > { %v1966_v2 = vcvt.s32.f32 %v596_v56  ;;  %v1968_v16 = vcvt.s32.f32 %v610_v57  ;;  %v624_v17 = vshra.s32 %v1946_v59, 16  ;;  %v638_v18 = vshra.s32 %v1952_v60, 16 }
  0x7c   : > { %515 = vmax.xlane.f32.xlu0 %v1876_v35  ;;  %529 = vmax.xlane.f32.xlu1 %v1878_v39  ;;  %v1976_v19 = vsel %vm2634_vm4, %v1761_v6, 0  ;;  %v1982_v29 = vsel %vm2633_vm5, %v1761_v6, 0  ;;  %vm2642_vm3 = vcmp.eq.s32.totalorder %v1959_v62, %v1764_v7  ;;  %vm2641_vm2 = vcmp.eq.s32.totalorder %v1962_v0, %v1764_v7 }
  0x7d   : > { %v1989_v30 = vadd.s32 144, %v1741_v58  ;;  %v1992_v40 = vadd.s32 152, %v1741_v58  ;;  %v1996_v41 = vcvt.s32.f32 %v624_v17  ;;  %v1998_v48 = vcvt.s32.f32 %v638_v18 }
  0x7e   : > { %v652_v49 = vshra.s32 %v1976_v19, 16  ;;  %v666_v56 = vshra.s32 %v1982_v29, 16  ;;  %v2006_v57 = vsel %vm2642_vm3, %v1761_v6, 0  ;;  %v2012_v61 = vsel %vm2641_vm2, %v1761_v6, 0 }
  0x7f   : > { %2740 = vst [vmem:[#allocation39_spill] sm:$0xff] %v1989_v30  ;;  %2741 = vst [vmem:[#allocation40_spill] sm:$0xff] %v1992_v40  ;;  %vm2650_vm5 = vcmp.eq.s32.totalorder %v1989_v30, %v1764_v7  ;;  %vm2649_vm4 = vcmp.eq.s32.totalorder %v1992_v40, %v1764_v7  ;;  %v2019_v17 = vadd.s32 160, %v1741_v58  ;;  %v2022_v18 = vadd.s32 168, %v1741_v58 }
  0x80   : > { %543 = vmax.xlane.f32.xlu0 %v1906_v46  ;;  %557 = vmax.xlane.f32.xlu1 %v1908_v47  ;;  %v2026_v36 = vcvt.s32.f32 %v652_v49  ;;  %v2028_v20 = vcvt.s32.f32 %v666_v56  ;;  %v680_v38 = vshra.s32 %v2006_v57, 16  ;;  %v694_v37 = vshra.s32 %v2012_v61, 16 }
  0x81   : > { %2742 = vst [vmem:[#allocation41_spill] sm:$0xff] %v2019_v17  ;;  %2743 = vst [vmem:[#allocation42_spill] sm:$0xff] %v2022_v18  ;;  %v2036_v0 = vsel %vm2650_vm5, %v1761_v6, 0  ;;  %v2042_v62 = vsel %vm2649_vm4, %v1761_v6, 0  ;;  %vm2658_vm2 = vcmp.eq.s32.totalorder %v2019_v17, %v1764_v7  ;;  %vm2657_vm3 = vcmp.eq.s32.totalorder %v2022_v18, %v1764_v7 }
  0x82   : > { %v2049_v49 = vadd.s32 176, %v1741_v58  ;;  %v2052_v56 = vadd.s32 184, %v1741_v58  ;;  %v2056_v30 = vcvt.s32.f32 %v680_v38  ;;  %v2058_v40 = vcvt.s32.f32 %v694_v37 }
  0x83   : > { %v708_v53 = vshra.s32 %v2036_v0, 16  ;;  %v722_v52 = vshra.s32 %v2042_v62, 16  ;;  %v2066_v45 = vsel %vm2658_vm2, %v1761_v6, 0  ;;  %v2072_v44 = vsel %vm2657_vm3, %v1761_v6, 0 }
  0x84   : > { %571 = vmax.xlane.f32.xlu0 %v1936_v54  ;;  %585 = vmax.xlane.f32.xlu1 %v1938_v55  ;;  %2744 = vst [vmem:[#allocation43_spill] sm:$0xff] %v2049_v49  ;;  %2745 = vst [vmem:[#allocation44_spill] sm:$0xff] %v2052_v56  ;;  %vm2666_vm4 = vcmp.eq.s32.totalorder %v2049_v49, %v1764_v7  ;;  %vm2665_vm5 = vcmp.eq.s32.totalorder %v2052_v56, %v1764_v7  ;;  %v2079_v37 = vadd.s32 192, %v1741_v58 }
  0x85   : > { %v2082_v38 = vadd.s32 200, %v1741_v58  ;;  %v2086_v17 = vcvt.s32.f32 %v708_v53  ;;  %v2088_v18 = vcvt.s32.f32 %v722_v52  ;;  %v736_v34 = vshra.s32 %v2066_v45, 16 }
  0x86   : > { %2746 = vst [vmem:[#allocation45_spill] sm:$0xff] %v2079_v37  ;;  %v750_v33 = vshra.s32 %v2072_v44, 16  ;;  %v2096_v22 = vsel %vm2666_vm4, %v1761_v6, 0  ;;  %v2102_v21 = vsel %vm2665_vm5, %v1761_v6, 0  ;;  %vm2676_vm3 = vcmp.eq.s32.totalorder %v2079_v37, %v1764_v7 }
  0x87   : > { %2747 = vst [vmem:[#allocation46_spill] sm:$0xff] %v2082_v38  ;;  %vm2675_vm2 = vcmp.eq.s32.totalorder %v2082_v38, %v1764_v7  ;;  %v2109_v52 = vadd.s32 208, %v1741_v58  ;;  %v2112_v53 = vadd.s32 216, %v1741_v58  ;;  %v2116_v49 = vcvt.s32.f32 %v736_v34 }
  0x88   : > { %599 = vmax.xlane.f32.xlu0 %v1966_v2  ;;  %613 = vmax.xlane.f32.xlu1 %v1968_v16  ;;  %v2118_v56 = vcvt.s32.f32 %v750_v33  ;;  %v764_v11 = vshra.s32 %v2096_v22, 16  ;;  %v778_v5 = vshra.s32 %v2102_v21, 16  ;;  %v2126_v10 = vsel %vm2676_vm3, %v1761_v6, 0 }
  0x89   : > { %2748 = vst [vmem:[#allocation47_spill] sm:$0xff] %v2109_v52  ;;  %2749 = vst [vmem:[#allocation48_spill] sm:$0xff] %v2112_v53  ;;  %v2132_v9 = vsel %vm2675_vm2, %v1761_v6, 0  ;;  %vm2686_vm5 = vcmp.eq.s32.totalorder %v2109_v52, %v1764_v7  ;;  %vm2685_vm4 = vcmp.eq.s32.totalorder %v2112_v53, %v1764_v7  ;;  %v2139_v33 = vadd.s32 224, %v1741_v58 }
  0x8a   : > { %2750 = vst [vmem:[#allocation49_spill] sm:$0xff] %v2126_v10  ;;  %2751 = vst [vmem:[#allocation50_spill] sm:$0xff] %v2132_v9  ;;  %v2142_v34 = vadd.s32 232, %v1741_v58  ;;  %v2146_v37 = vcvt.s32.f32 %v764_v11  ;;  %v2148_v38 = vcvt.s32.f32 %v778_v5  ;;  %v792_v3 = vshra.s32 %v2126_v10, 16 }
  0x8b   : > { %2752 = vst [vmem:[#allocation51_spill] sm:$0xff] %v2139_v33  ;;  %v806_v8 = vshra.s32 %v2132_v9, 16  ;;  %v2156_v4 = vsel %vm2686_vm5, %v1761_v6, 0  ;;  %v2162_v63 = vsel %vm2685_vm4, %v1761_v6, 0  ;;  %vm2706_vm2 = vcmp.eq.s32.totalorder %v2139_v33, %v1764_v7 }
  0x8c   : > { %627 = vmax.xlane.f32.xlu0 %v1996_v41  ;;  %641 = vmax.xlane.f32.xlu1 %v1998_v48  ;;  %2753 = vst [vmem:[#allocation52_spill] sm:$0xff] %v2142_v34  ;;  %2754 = vst [vmem:[#allocation53_spill] sm:$0xff] %v2162_v63  ;;  %vm2705_vm3 = vcmp.eq.s32.totalorder %v2142_v34, %v1764_v7  ;;  %v2169_v5 = vadd.s32 240, %v1741_v58  ;;  %v2172_v11 = vadd.s32 248, %v1741_v58  ;;  %v2176_v52 = vcvt.s32.f32 %v792_v3 }
  0x8d   : > { %v2178_v53 = vcvt.s32.f32 %v806_v8  ;;  %v820_v1 = vshra.s32 %v2156_v4, 16  ;;  %v834_v9 = vshra.s32 %v2162_v63, 16  ;;  %v2186_v10 = vsel %vm2706_vm2, %v1761_v6, 0 }
  0x8e   : > { %2755 = vst [vmem:[#allocation54_spill] sm:$0xff] %v2169_v5  ;;  %2756 = vst [vmem:[#allocation55_spill] sm:$0xff] %v2172_v11  ;;  %v2192_v58 = vsel %vm2705_vm3, %v1761_v6, 0  ;;  %vm2702_vm4 = vcmp.eq.s32.totalorder %v2169_v5, %v1764_v7  ;;  %vm2701_vm5 = vcmp.eq.s32.totalorder %v2172_v11, %v1764_v7  ;;  %v848_v33 = vshra.s32 %v2186_v10, 16 }
  0x8f   : > { %2757 = vst [vmem:[#allocation56_spill] sm:$0xff] %v2176_v52  ;;  %2758 = vst [vmem:[#allocation57_spill] sm:$0xff] %v2186_v10  ;;  %v2200_v3 = vcvt.s32.f32 %v820_v1  ;;  %v2202_v8 = vcvt.s32.f32 %v834_v9  ;;  %v862_v34 = vshra.s32 %v2192_v58, 16  ;;  %v2210_v63 = vsel %vm2702_vm4, %v1761_v6, 0 }
  0x90   : > { %655 = vmax.xlane.f32.xlu0 %v2026_v36  ;;  %669 = vmax.xlane.f32.xlu1 %v2028_v20  ;;  %2759 = vst [vmem:[#allocation58_spill] sm:$0xff] %v2192_v58  ;;  %v2220_v1 = vcvt.s32.f32 %v848_v33  ;;  %v876_v58 = vshra.s32 %v2210_v63, 16  ;;  %v455_v33 = vand.u32 65535, %v1790_v12  ;;  %v469_v7 = vand.u32 65535, %v1802_v14 }
  0x91   : > { %v2222_v9 = vcvt.s32.f32 %v862_v34  ;;  %v483_v34 = vand.u32 65535, %v1796_v13  ;;  %v511_v13 = vand.u32 65535, %v1836_v25 }
  0x92   : > { %2761 = vst [vmem:[#allocation60_spill] sm:$0xff] %v2220_v1  ;;  %v2228_v10 = vcvt.s32.f32 %v876_v58  ;;  %v457_v11 = vcvt.s32.f32 %v455_v33  ;;  %v497_v58 = vand.u32 65535, %v1808_v15  ;;  %v471_v12 = vcvt.s32.f32 %v469_v7 }
  0x93   : > { %2762 = vst [vmem:[#allocation61_spill] sm:$0xff] %v2222_v9  ;;  %v539_v7 = vand.u32 65535, %v1856_v31  ;;  %v567_v31 = vand.u32 65535, %v1886_v42  ;;  %v595_v42 = vand.u32 65535, %v1916_v50  ;;  %v623_v50 = vand.u32 65535, %v1946_v59 }
  0x94   : > { %683 = vmax.xlane.f32.xlu0 %v2056_v30  ;;  %697 = vmax.xlane.f32.xlu1 %v2058_v40  ;;  %2763 = vst [vmem:[#allocation62_spill] sm:$0xff] %v2228_v10  ;;  %v651_v59 = vand.u32 65535, %v1976_v19  ;;  %v679_v19 = vand.u32 65535, %v2006_v57  ;;  %v707_v57 = vand.u32 65535, %v2036_v0  ;;  %v735_v0 = vand.u32 65535, %v2066_v45 }
  0x95   : > { %v763_v45 = vand.u32 65535, %v2096_v22 }
  0x98   : > { %711 = vmax.xlane.f32.xlu0 %v2086_v17  ;;  %725 = vmax.xlane.f32.xlu1 %v2088_v18 }
  0x9c   : > { %739 = vmax.xlane.f32.xlu0 %v2116_v49  ;;  %753 = vmax.xlane.f32.xlu1 %v2118_v56 }
  0xa0   : > { %767 = vmax.xlane.f32.xlu0 %v2146_v37  ;;  %781 = vmax.xlane.f32.xlu1 %v2148_v38 }
  0xa4   : > { %795 = vmax.xlane.f32.xlu0 %v2176_v52  ;;  %809 = vmax.xlane.f32.xlu1 %v2178_v53  ;;  %v2216_v52 = vsel %vm2701_vm5, %v1761_v6, 0 }
  0xa5   : > { %2760 = vst [vmem:[#allocation59_spill] sm:$0xff] %v2216_v52  ;;  %v890_v5 = vshra.s32 %v2216_v52, 16 }
  0xa7   : > { %v2230_v6 = vcvt.s32.f32 %v890_v5 }
  0xa8   : > { %823 = vmax.xlane.f32.xlu0 %v2200_v3  ;;  %837 = vmax.xlane.f32.xlu1 %v2202_v8 }
  0xa9   : > { %2764 = vst [vmem:[#allocation63_spill] sm:$0xff] %v2230_v6 }
  0xac   : > { %851 = vmax.xlane.f32.xlu0 %v2220_v1  ;;  %865 = vmax.xlane.f32.xlu1 %v2222_v9  ;;  %v485_v9 = vcvt.s32.f32 %v483_v34  ;;  %v525_v34 = vand.u32 65535, %v1842_v26  ;;  %v553_v26 = vand.u32 65535, %v1862_v32  ;;  %v581_v32 = vand.u32 65535, %v1892_v43 }
  0xad   : > { %v609_v43 = vand.u32 65535, %v1922_v51  ;;  %v637_v51 = vand.u32 65535, %v1952_v60  ;;  %v665_v60 = vand.u32 65535, %v1982_v29  ;;  %v693_v29 = vand.u32 65535, %v2012_v61 }
  0xae   : > { %v721_v61 = vand.u32 65535, %v2042_v62  ;;  %v749_v62 = vand.u32 65535, %v2072_v44  ;;  %v777_v44 = vand.u32 65535, %v2102_v21 }
  0xb0   : > { %879 = vmax.xlane.f32.xlu0 %v2228_v10  ;;  %893 = vmax.xlane.f32.xlu1 %v2230_v6  ;;  %v499_v10 = vcvt.s32.f32 %v497_v58 }
  0xfd   : > { %v2237_v52 = vpop.xlane.xlu0 %459  ;;  %v2239_v1 = vpop.xlane.xlu1 %487 }
  0xfe   : > { %vm461_vm5 = vcmp.eq.f32.partialorder %v1824_v23, %v2237_v52  ;;  %vm489_vm4 = vcmp.eq.f32.partialorder %v1826_v24, %v2239_v1  ;;  %v513_v23 = vcvt.s32.f32 %v511_v13 }
  0xff   : > { %v462_v5 = vsel %vm461_vm5, %v457_v11, -inf  ;;  %v490_v14 = vsel %vm489_vm4, %v485_v9, -inf  ;;  %v527_v9 = vcvt.s32.f32 %v525_v34 }
 0x100   : > { %463 = vmax.xlane.f32.xlu0 %v462_v5 }
 0x101   : > { %v2247_v33 = vpop.xlane.xlu0 %473  ;;  %v2249_v6 = vpop.xlane.xlu1 %501 }
 0x102   : > { %vm475_vm3 = vcmp.eq.f32.partialorder %v1846_v27, %v2247_v33  ;;  %vm503_vm2 = vcmp.eq.f32.partialorder %v1848_v28, %v2249_v6  ;;  %v541_v28 = vcvt.s32.f32 %v539_v7 }
 0x103   : > { %v476_v15 = vsel %vm475_vm3, %v471_v12, -inf  ;;  %v504_v25 = vsel %vm503_vm2, %v499_v10, -inf  ;;  %v555_v12 = vcvt.s32.f32 %v553_v26 }
 0x104   : > { %477 = vmax.xlane.f32.xlu1 %v476_v15  ;;  %491 = vmax.xlane.f32.xlu0 %v490_v14  ;;  %v583_v15 = vcvt.s32.f32 %v581_v32 }
 0x105   : > { %v2257_v24 = vpop.xlane.xlu0 %515  ;;  %v2259_v11 = vpop.xlane.xlu1 %529 }
 0x106   : > { %vm517_vm4 = vcmp.eq.f32.partialorder %v1876_v35, %v2257_v24  ;;  %vm531_vm5 = vcmp.eq.f32.partialorder %v1878_v39, %v2259_v11  ;;  %v569_v39 = vcvt.s32.f32 %v567_v31  ;;  %v639_v31 = vcvt.s32.f32 %v637_v51 }
 0x107   : > { %v518_v27 = vsel %vm517_vm4, %v513_v23, -inf  ;;  %v532_v10 = vsel %vm531_vm5, %v527_v9, -inf  ;;  %v611_v9 = vcvt.s32.f32 %v609_v43 }
 0x108   : > { %505 = vmax.xlane.f32.xlu1 %v504_v25  ;;  %519 = vmax.xlane.f32.xlu0 %v518_v27 }
 0x109   : > { %v2267_v58 = vpop.xlane.xlu0 %543  ;;  %v2269_v5 = vpop.xlane.xlu1 %557 }
 0x10a   : > { %vm545_vm2 = vcmp.eq.f32.partialorder %v1906_v46, %v2267_v58  ;;  %vm559_vm3 = vcmp.eq.f32.partialorder %v1908_v47, %v2269_v5  ;;  %v597_v47 = vcvt.s32.f32 %v595_v42 }
 0x10b   : > { %v546_v35 = vsel %vm545_vm2, %v541_v28, -inf  ;;  %v560_v14 = vsel %vm559_vm3, %v555_v12, -inf }
 0x10c   : > { %533 = vmax.xlane.f32.xlu1 %v532_v10  ;;  %547 = vmax.xlane.f32.xlu0 %v546_v35  ;;  %v667_v35 = vcvt.s32.f32 %v665_v60  ;;  %v779_v60 = vcvt.s32.f32 %v777_v44 }
 0x10d   : > { %v2277_v13 = vpop.xlane.xlu0 %571  ;;  %v2279_v34 = vpop.xlane.xlu1 %585 }
 0x10e   : > { %vm573_vm4 = vcmp.eq.f32.partialorder %v1936_v54, %v2277_v13  ;;  %vm587_vm5 = vcmp.eq.f32.partialorder %v1938_v55, %v2279_v34  ;;  %v625_v55 = vcvt.s32.f32 %v623_v50  ;;  %v723_v50 = vcvt.s32.f32 %v721_v61 }
 0x10f   : > { %v574_v46 = vsel %vm573_vm4, %v569_v39, -inf  ;;  %v588_v7 = vsel %vm587_vm5, %v583_v15, -inf  ;;  %v695_v15 = vcvt.s32.f32 %v693_v29 }
 0x110   : > { %561 = vmax.xlane.f32.xlu1 %v560_v14  ;;  %575 = vmax.xlane.f32.xlu0 %v574_v46 }
 0x111   : > { %v2287_v23 = vpop.xlane.xlu0 %599  ;;  %v2289_v25 = vpop.xlane.xlu1 %613 }
 0x112   : > { %vm601_vm2 = vcmp.eq.f32.partialorder %v1966_v2, %v2287_v23  ;;  %vm615_vm3 = vcmp.eq.f32.partialorder %v1968_v16, %v2289_v25  ;;  %v653_v16 = vcvt.s32.f32 %v651_v59 }
 0x113   : > { %v602_v54 = vsel %vm601_vm2, %v597_v47, -inf  ;;  %v616_v27 = vsel %vm615_vm3, %v611_v9, -inf }
 0x114   : > { %589 = vmax.xlane.f32.xlu1 %v588_v7  ;;  %603 = vmax.xlane.f32.xlu0 %v602_v54  ;;  %v751_v54 = vcvt.s32.f32 %v749_v62  ;;  %v875_v62 = vand.u32 65535, %v2210_v63 }
 0x115   : > { %v2297_v26 = vpop.xlane.xlu0 %627  ;;  %v2299_v28 = vpop.xlane.xlu1 %641 }
 0x116   : > { %vm629_vm4 = vcmp.eq.f32.partialorder %v1996_v41, %v2297_v26  ;;  %vm643_vm5 = vcmp.eq.f32.partialorder %v1998_v48, %v2299_v28  ;;  %v681_v48 = vcvt.s32.f32 %v679_v19 }
 0x117   : > { %v630_v2 = vsel %vm629_vm4, %v625_v55, -inf  ;;  %v644_v12 = vsel %vm643_vm5, %v639_v31, -inf  ;;  %v2765_v55 = vld [vmem:[#allocation49_spill] sm:$0xff] }
 0x118   : > { %617 = vmax.xlane.f32.xlu1 %v616_v27  ;;  %631 = vmax.xlane.f32.xlu0 %v630_v2  ;;  %v791_v22 = vand.u32 65535, %v2765_v55  ;;  %v2766_v2 = vld [vmem:[#allocation50_spill] sm:$0xff] }
 0x119   : > { %v2307_v10 = vpop.xlane.xlu0 %655  ;;  %v2309_v32 = vpop.xlane.xlu1 %669  ;;  %v805_v21 = vand.u32 65535, %v2766_v2  ;;  %v2775_v2 = vld [vmem:[#allocation63_spill] sm:$0xff] }
 0x11a   : > { %vm657_vm2 = vcmp.eq.f32.partialorder %v2026_v36, %v2307_v10  ;;  %vm671_vm3 = vcmp.eq.f32.partialorder %v2028_v20, %v2309_v32  ;;  %v709_v36 = vcvt.s32.f32 %v707_v57  ;;  %v2768_v57 = vld [vmem:[#allocation56_spill] sm:$0xff] }
 0x11b   : > { %v658_v41 = vsel %vm657_vm2, %v653_v16, -inf  ;;  %v672_v42 = vsel %vm671_vm3, %v667_v35, -inf  ;;  %v819_v16 = vand.u32 65535, %v2156_v4  ;;  %v807_v29 = vcvt.s32.f32 %v805_v21 }
 0x11c   : > { %645 = vmax.xlane.f32.xlu1 %v644_v12  ;;  %659 = vmax.xlane.f32.xlu0 %v658_v41  ;;  %v2767_v41 = vld [vmem:[#allocation53_spill] sm:$0xff] }
 0x11d   : > { %v2317_v39 = vpop.xlane.xlu0 %683  ;;  %v2319_v14 = vpop.xlane.xlu1 %697 }
 0x11e   : > { %vm685_vm4 = vcmp.eq.f32.partialorder %v2056_v30, %v2317_v39  ;;  %vm699_vm5 = vcmp.eq.f32.partialorder %v2058_v40, %v2319_v14  ;;  %v737_v40 = vcvt.s32.f32 %v735_v0  ;;  %v2770_v0 = vld [vmem:[#allocation58_spill] sm:$0xff] }
 0x11f   : > { %v686_v20 = vsel %vm685_vm4, %v681_v48, -inf  ;;  %v700_v46 = vsel %vm699_vm5, %v695_v15, -inf  ;;  %v833_v48 = vand.u32 65535, %v2767_v41  ;;  %v2779_v41 = vld [vmem:[#allocation16_spill] sm:$0xff] }
 0x120   : > { %673 = vmax.xlane.f32.xlu1 %v672_v42  ;;  %687 = vmax.xlane.f32.xlu0 %v686_v20  ;;  %v2769_v42 = vld [vmem:[#allocation57_spill] sm:$0xff] }
 0x121   : > { %v2327_v43 = vpop.xlane.xlu0 %711  ;;  %v2329_v47 = vpop.xlane.xlu1 %725  ;;  %v847_v4 = vand.u32 65535, %v2769_v42 }
 0x122   : > { %vm713_vm2 = vcmp.eq.f32.partialorder %v2086_v17, %v2327_v43  ;;  %vm727_vm3 = vcmp.eq.f32.partialorder %v2088_v18, %v2329_v47  ;;  %v765_v18 = vcvt.s32.f32 %v763_v45 }
 0x123   : > { %v714_v30 = vsel %vm713_vm2, %v709_v36, -inf  ;;  %v728_v9 = vsel %vm727_vm3, %v723_v50, -inf  ;;  %v835_v36 = vcvt.s32.f32 %v833_v48  ;;  %v849_v50 = vcvt.s32.f32 %v847_v4 }
 0x124   : > { %701 = vmax.xlane.f32.xlu1 %v700_v46  ;;  %715 = vmax.xlane.f32.xlu0 %v714_v30  ;;  %v861_v46 = vand.u32 65535, %v2770_v0  ;;  %v1610_v48 = vmov 1.0   ;;  %v522_v4 = vcvt.f32.s32 %v2257_v24  ;;  %v480_v0 = vcvt.f32.s32 %v2247_v33 }
 0x125   : > { %v2337_v7 = vpop.xlane.xlu0 %739  ;;  %v2339_v51 = vpop.xlane.xlu1 %753  ;;  %v508_v24 = vcvt.f32.s32 %v2249_v6  ;;  %v578_v33 = vcvt.f32.s32 %v2277_v13 }
 0x126   : > { %vm741_vm4 = vcmp.eq.f32.partialorder %v2116_v49, %v2337_v7  ;;  %vm755_vm5 = vcmp.eq.f32.partialorder %v2118_v56, %v2339_v51  ;;  %v793_v56 = vcvt.s32.f32 %v791_v22 }
 0x127   : > { %v742_v17 = vsel %vm741_vm4, %v737_v40, -inf  ;;  %v756_v27 = vsel %vm755_vm5, %v751_v54, -inf  ;;  %v2771_v54 = vld [vmem:[#allocation59_spill] sm:$0xff] }
 0x128   : > { %729 = vmax.xlane.f32.xlu1 %v728_v9  ;;  %743 = vmax.xlane.f32.xlu0 %v742_v17  ;;  %v863_v9 = vcvt.s32.f32 %v861_v46  ;;  %v889_v44 = vand.u32 65535, %v2771_v54  ;;  %v2772_v17 = vld [vmem:[#allocation60_spill] sm:$0xff] }
 0x129   : > { %v2347_v59 = vpop.xlane.xlu0 %767  ;;  %v2349_v31 = vpop.xlane.xlu1 %781 }
 0x12a   : > { %vm769_vm2 = vcmp.eq.f32.partialorder %v2146_v37, %v2347_v59  ;;  %vm783_vm3 = vcmp.eq.f32.partialorder %v2148_v38, %v2349_v31  ;;  %v821_v38 = vcvt.s32.f32 %v819_v16  ;;  %v2777_v16 = vld [vmem:[#allocation18_spill] sm:$0xff] }
 0x12b   : > { %v770_v49 = vsel %vm769_vm2, %v765_v18, -inf  ;;  %v784_v12 = vsel %vm783_vm3, %v779_v60, -inf  ;;  %v877_v18 = vcvt.s32.f32 %v875_v62  ;;  %v2774_v60 = vld [vmem:[#allocation62_spill] sm:$0xff] }
 0x12c   : > { %757 = vmax.xlane.f32.xlu1 %v756_v27  ;;  %771 = vmax.xlane.f32.xlu0 %v770_v49  ;;  %v891_v27 = vcvt.s32.f32 %v889_v44  ;;  %v523_v44 = vshll.u32 %v522_v4, 16  ;;  %v592_v4 = vcvt.f32.s32 %v2279_v34 }
 0x12d   : > { %v2357_v19 = vpop.xlane.xlu0 %795  ;;  %v2359_v35 = vpop.xlane.xlu1 %809 }
 0x12e   : > { %vm797_vm4 = vcmp.eq.f32.partialorder %v2768_v57, %v2357_v19  ;;  %vm811_vm5 = vcmp.eq.f32.partialorder %v2178_v53, %v2359_v35 }
 0x12f   : > { %v798_v37 = vsel %vm797_vm4, %v793_v56, -inf  ;;  %v812_v61 = vsel %vm811_vm5, %v807_v29, -inf  ;;  %v2776_v56 = vld [vmem:[#allocation19_spill] sm:$0xff]  ;;  %v2778_v29 = vld [vmem:[#allocation21_spill] sm:$0xff] }
 0x130   : > { %785 = vmax.xlane.f32.xlu1 %v784_v12  ;;  %799 = vmax.xlane.f32.xlu0 %v798_v37  ;;  %v991_v12 = vrot.slane %v2777_v16, %v2776_v56  ;;  %v466_v37 = vcvt.f32.s32 %v2237_v52 }
 0x131   : > { %v2367_v15 = vpop.xlane.xlu0 %823  ;;  %v2369_v20 = vpop.xlane.xlu1 %837 }
 0x132   : > { %vm825_vm2 = vcmp.eq.f32.partialorder %v2200_v3, %v2367_v15  ;;  %vm839_vm3 = vcmp.eq.f32.partialorder %v2202_v8, %v2369_v20  ;;  %v2773_v3 = vld [vmem:[#allocation61_spill] sm:$0xff]  ;;  %v467_v46 = vshll.u32 %v466_v37, 16  ;;  %v509_v37 = vshll.u32 %v508_v24, 16 }
 0x133   : > { %v826_v53 = vsel %vm825_vm2, %v821_v38, -inf  ;;  %v840_v40 = vsel %vm839_vm3, %v835_v36, -inf  ;;  %v494_v36 = vcvt.f32.s32 %v2239_v1  ;;  %v564_v1 = vcvt.f32.s32 %v2269_v5 }
 0x134   : > { %813 = vmax.xlane.f32.xlu1 %v812_v61  ;;  %827 = vmax.xlane.f32.xlu0 %v826_v53  ;;  %v536_v53 = vcvt.f32.s32 %v2259_v11  ;;  %v593_v24 = vshll.u32 %v592_v4, 16 }
 0x135   : > { %v2377_v30 = vpop.xlane.xlu0 %851  ;;  %v2379_v45 = vpop.xlane.xlu1 %865 }
 0x136   : > { %vm853_vm4 = vcmp.eq.f32.partialorder %v2772_v17, %v2377_v30  ;;  %vm867_vm5 = vcmp.eq.f32.partialorder %v2773_v3, %v2379_v45  ;;  %v495_v3 = vshll.u32 %v494_v36, 16 }
 0x137   : > { %v854_v8 = vsel %vm853_vm4, %v849_v50, -inf  ;;  %v868_v55 = vsel %vm867_vm5, %v863_v9, -inf  ;;  %vm993_vm4 = vcmp.eq.s32.totalorder %v2778_v29, %v991_v12  ;;  %vm992_vm5 = vcmp.eq.s32.totalorder %v2779_v41, %v991_v12 }
 0x138   : > { %841 = vmax.xlane.f32.xlu1 %v840_v40  ;;  %855 = vmax.xlane.f32.xlu0 %v854_v8  ;;  %v550_v50 = vcvt.f32.s32 %v2267_v58  ;;  %v481_v8 = vshll.u32 %v480_v0, 16  ;;  %v606_v0 = vcvt.f32.s32 %v2287_v23 }
 0x139   : > { %v2386_v63 = vpop.xlane.xlu0 %879  ;;  %v2388_v22 = vpop.xlane.xlu1 %893  ;;  %1412 = vmatprep.subr.msk.mxu0 %vm993_vm4, %v1610_v48 }
 0x13a   : > { %vm881_vm2 = vcmp.eq.f32.partialorder %v2774_v60, %v2386_v63  ;;  %vm895_vm3 = vcmp.eq.f32.partialorder %v2775_v2, %v2388_v22  ;;  %1413 = vmatpush3.xpose.msk.msra.mxu0 %vm993_vm4, %v1610_v48  ;;  %v551_v11 = vshll.u32 %v550_v50, 16 }
 0x13b   : > { %v882_v21 = vsel %vm881_vm2, %v877_v18, -inf  ;;  %v896_v49 = vsel %vm895_vm3, %v891_v27, -inf  ;;  %1414 = vmatprep.subr.msk.mxu0 %vm992_vm5, %v1610_v48  ;;  %v537_v18 = vshll.u32 %v536_v53, 16 }
 0x13c   : > { %869 = vmax.xlane.f32.xlu1 %v868_v55  ;;  %883 = vmax.xlane.f32.xlu0 %v882_v21 }
 0x13e   : > { %1415 = vmatpush3.xpose.msk.msra.mxu0 %vm992_vm5, %v1610_v48 }
 0x140   : > { %897 = vmax.xlane.f32.xlu1 %v896_v49  ;;  %v2780_v49 = vld [vmem:[#allocation24_spill] sm:$0xff] }
 0x189   : > { %v464_v57 = vpop.xlane.xlu0 %463 }
 0x18a   : > { %v465_v61 = vcvt.f32.s32 %v464_v57 }
 0x18c   : > { %v468_v52 = vadd.s32 %v467_v46, %v465_v61 }
 0x18d   : > { %v478_v38 = vpop.xlane.xlu1 %477  ;;  %v492_v42 = vpop.xlane.xlu0 %491 }
 0x18e   : > { %v479_v62 = vcvt.f32.s32 %v478_v38  ;;  %v493_v40 = vcvt.f32.s32 %v492_v42  ;;  %v903_v12 = vsel %vm390_vm6, %v468_v52, 0  ;;  %v565_v38 = vshll.u32 %v564_v1, 16 }
 0x18f   : > { %v579_v42 = vshll.u32 %v578_v33, 16  ;;  %v607_v33 = vshll.u32 %v606_v0, 16 }
 0x190   : > { %v482_v27 = vadd.s32 %v481_v8, %v479_v62  ;;  %v496_v58 = vadd.s32 %v495_v3, %v493_v40 }
 0x191   : > { %v506_v9 = vpop.xlane.xlu1 %505  ;;  %v520_v54 = vpop.xlane.xlu0 %519 }
 0x192   : > { %v521_v17 = vcvt.f32.s32 %v520_v54  ;;  %v507_v60 = vcvt.f32.s32 %v506_v9  ;;  %v904_v46 = vsel %vm391_vm8, %v482_v27, 0  ;;  %v905_v50 = vsel %vm392_vm7, %v496_v58, 0 }
 0x194   : > { %v524_v55 = vadd.s32 %v523_v44, %v521_v17  ;;  %v510_v62 = vadd.s32 %v509_v37, %v507_v60 }
 0x195   : > { %v534_v2 = vpop.xlane.xlu1 %533  ;;  %v548_v21 = vpop.xlane.xlu0 %547 }
 0x196   : > { %v907_v6 = vsel %vm394_vm10, %v524_v55, 0  ;;  %v535_v57 = vcvt.f32.s32 %v534_v2  ;;  %v549_v5 = vcvt.f32.s32 %v548_v21  ;;  %v620_v55 = vcvt.f32.s32 %v2289_v25 }
 0x197   : > { %v935_v13 = vadd.s32 %v907_v6, %v903_v12  ;;  %v906_v58 = vsel %vm393_vm9, %v510_v62, 0  ;;  %v2797_v62 = vld [vmem:[#allocation36_spill] sm:$0xff] }
 0x198   : > { %v538_v61 = vadd.s32 %v537_v18, %v535_v57  ;;  %v552_v36 = vadd.s32 %v551_v11, %v549_v5  ;;  %v634_v11 = vcvt.f32.s32 %v2297_v26  ;;  %vm2798_vm9 = vcmp.eq.s32.totalorder %v2797_v62, %v2780_v49 }
 0x199   : > { %v562_v40 = vpop.xlane.xlu1 %561  ;;  %v576_v9 = vpop.xlane.xlu0 %575 }
 0x19a   : > { %v908_v44 = vsel %vm395_vm11, %v538_v61, 0  ;;  %v909_v52 = vsel %vm396_vm12, %v552_v36, 0  ;;  %v563_v23 = vcvt.f32.s32 %v562_v40  ;;  %v577_v17 = vcvt.f32.s32 %v576_v9 }
 0x19b   : > { %v936_v3 = vadd.s32 %v908_v44, %v904_v46  ;;  %v937_v8 = vadd.s32 %v909_v52, %v905_v50  ;;  %v635_v4 = vshll.u32 %v634_v11, 16  ;;  %v648_v61 = vcvt.f32.s32 %v2299_v28 }
 0x19c   : > { %v566_v1 = vadd.s32 %v565_v38, %v563_v23  ;;  %v580_v18 = vadd.s32 %v579_v42, %v577_v17  ;;  %v621_v42 = vshll.u32 %v620_v55, 16  ;;  %v662_v36 = vcvt.f32.s32 %v2307_v10  ;;  %v2791_v55 = vld [vmem:[#allocation33_spill] sm:$0xff] }
 0x19d   : > { %v590_v60 = vpop.xlane.xlu1 %589  ;;  %v604_v2 = vpop.xlane.xlu0 %603  ;;  %v649_v23 = vshll.u32 %v648_v61, 16  ;;  %v676_v10 = vcvt.f32.s32 %v2309_v32  ;;  %v690_v17 = vcvt.f32.s32 %v2317_v39  ;;  %vm2792_vm6 = vcmp.eq.s32.totalorder %v2791_v55, %v2780_v49  ;;  %v2803_v55 = vld [vmem:[#allocation39_spill] sm:$0xff] }
 0x19e   : > { %v910_v12 = vsel %vm397_vm13, %v566_v1, 0  ;;  %v911_v6 = vsel %vm398_vm14, %v580_v18, 0  ;;  %v591_v57 = vcvt.f32.s32 %v590_v60  ;;  %v605_v5 = vcvt.f32.s32 %v604_v2  ;;  %v2801_v18 = vld [vmem:[#allocation38_spill] sm:$0xff] }
 0x19f   : > { %v938_v37 = vadd.s32 %v910_v12, %v906_v58  ;;  %v939_v25 = vadd.s32 %v935_v13, %v911_v6  ;;  %v663_v28 = vshll.u32 %v662_v36, 16  ;;  %v677_v21 = vshll.u32 %v676_v10, 16 }
 0x1a0   : > { %v594_v38 = vadd.s32 %v593_v24, %v591_v57  ;;  %v608_v26 = vadd.s32 %v607_v33, %v605_v5  ;;  %v691_v32 = vshll.u32 %v690_v17, 16  ;;  %v704_v39 = vcvt.f32.s32 %v2319_v14  ;;  %v2793_v57 = vld [vmem:[#allocation34_spill] sm:$0xff] }
 0x1a1   : > { %v618_v0 = vpop.xlane.xlu1 %617  ;;  %v632_v46 = vpop.xlane.xlu0 %631  ;;  %v718_v12 = vcvt.f32.s32 %v2327_v43  ;;  %vm2794_vm7 = vcmp.eq.s32.totalorder %v2793_v57, %v2780_v49  ;;  %v732_v43 = vcvt.f32.s32 %v2329_v47  ;;  %v774_v17 = vcvt.f32.s32 %v2347_v59  ;;  %v2807_v57 = vld [vmem:[#allocation41_spill] sm:$0xff] }
 0x1a2   : > { %v912_v50 = vsel %vm399_vm15, %v594_v38, 0  ;;  %v913_v40 = vsel %vm400_vm0, %v608_v26, 0  ;;  %v619_v9 = vcvt.f32.s32 %v618_v0  ;;  %v633_v13 = vcvt.f32.s32 %v632_v46  ;;  %v2795_v38 = vld [vmem:[#allocation35_spill] sm:$0xff] }
 0x1a3   : > { %v940_v54 = vadd.s32 %v936_v3, %v912_v50  ;;  %v941_v44 = vadd.s32 %v937_v8, %v913_v40  ;;  %vm2796_vm8 = vcmp.eq.s32.totalorder %v2795_v38, %v2780_v49  ;;  %v705_v0 = vshll.u32 %v704_v39, 16 }
 0x1a4   : > { %v622_v34 = vadd.s32 %v621_v42, %v619_v9  ;;  %v636_v52 = vadd.s32 %v635_v4, %v633_v13  ;;  %v719_v14 = vshll.u32 %v718_v12, 16  ;;  %v746_v46 = vcvt.f32.s32 %v2337_v7  ;;  %v2799_v9 = vld [vmem:[#allocation37_spill] sm:$0xff] }
 0x1a5   : > { %v646_v24 = vpop.xlane.xlu1 %645  ;;  %v660_v1 = vpop.xlane.xlu0 %659  ;;  %vm2800_vm10 = vcmp.eq.s32.totalorder %v2799_v9, %v2780_v49  ;;  %v733_v10 = vshll.u32 %v732_v43, 16  ;;  %v760_v7 = vcvt.f32.s32 %v2339_v51  ;;  %vm2802_vm11 = vcmp.eq.s32.totalorder %v2801_v18, %v2780_v49  ;;  %v2809_v43 = vld [vmem:[#allocation42_spill] sm:$0xff] }
 0x1a6   : > { %v914_v33 = vsel %vm401_vm1, %v622_v34, 0  ;;  %v915_v11 = vsel %vm2792_vm6, %v636_v52, 0  ;;  %v647_v3 = vcvt.f32.s32 %v646_v24  ;;  %v661_v8 = vcvt.f32.s32 %v660_v1 }
 0x1a7   : > { %v942_v27 = vadd.s32 %v938_v37, %v914_v33  ;;  %v943_v58 = vadd.s32 %v939_v25, %v915_v11  ;;  %v747_v47 = vshll.u32 %v746_v46, 16  ;;  %vm2804_vm12 = vcmp.eq.s32.totalorder %v2803_v55, %v2780_v49 }
 0x1a8   : > { %v650_v60 = vadd.s32 %v649_v23, %v647_v3  ;;  %v664_v2 = vadd.s32 %v663_v28, %v661_v8  ;;  %v775_v51 = vshll.u32 %v774_v17, 16  ;;  %v788_v59 = vcvt.f32.s32 %v2349_v31 }
 0x1a9   : > { %v674_v48 = vpop.xlane.xlu1 %673  ;;  %v688_v6 = vpop.xlane.xlu0 %687  ;;  %vm2808_vm14 = vcmp.eq.s32.totalorder %v2807_v57, %v2780_v49  ;;  %vm2810_vm15 = vcmp.eq.s32.totalorder %v2809_v43, %v2780_v49 }
 0x1aa   : > { %v916_v5 = vsel %vm2794_vm7, %v650_v60, 0  ;;  %v917_v26 = vsel %vm2796_vm8, %v664_v2, 0  ;;  %v675_v37 = vcvt.f32.s32 %v674_v48  ;;  %v689_v25 = vcvt.f32.s32 %v688_v6  ;;  %v2805_v48 = vld [vmem:[#allocation40_spill] sm:$0xff] }
 0x1ab   : > { %v944_v42 = vadd.s32 %v940_v54, %v916_v5  ;;  %v945_v4 = vadd.s32 %v941_v44, %v917_v26  ;;  %vm2806_vm13 = vcmp.eq.s32.totalorder %v2805_v48, %v2780_v49 }
 0x1ac   : > { %v678_v61 = vadd.s32 %v677_v21, %v675_v37  ;;  %v692_v36 = vadd.s32 %v691_v32, %v689_v25  ;;  %v761_v21 = vshll.u32 %v760_v7, 16  ;;  %v802_v32 = vcvt.f32.s32 %v2357_v19  ;;  %v2815_v7 = vld [vmem:[#allocation45_spill] sm:$0xff] }
 0x1ad   : > { %v702_v53 = vpop.xlane.xlu1 %701  ;;  %v716_v50 = vpop.xlane.xlu0 %715  ;;  %v816_v19 = vcvt.f32.s32 %v2359_v35  ;;  %vm2816_vm2 = vcmp.eq.s32.totalorder %v2815_v7, %v2780_v49  ;;  %v2834_v7 = vld [vmem:[#allocation13_spill] sm:$0xff] }
 0x1ae   : > { %v918_v40 = vsel %vm2798_vm9, %v678_v61, 0  ;;  %v919_v13 = vsel %vm2800_vm10, %v692_v36, 0  ;;  %v703_v54 = vcvt.f32.s32 %v702_v53  ;;  %v717_v44 = vcvt.f32.s32 %v716_v50  ;;  %v2811_v53 = vld [vmem:[#allocation43_spill] sm:$0xff] }
 0x1af   : > { %v946_v34 = vadd.s32 %v942_v27, %v918_v40  ;;  %v947_v52 = vadd.s32 %v943_v58, %v919_v13  ;;  %v789_v61 = vshll.u32 %v788_v59, 16  ;;  %v803_v31 = vshll.u32 %v802_v32, 16 }
 0x1b0   : > { %v706_v23 = vadd.s32 %v705_v0, %v703_v54  ;;  %v720_v28 = vadd.s32 %v719_v14, %v717_v44  ;;  %v830_v36 = vcvt.f32.s32 %v2367_v15  ;;  %vm2812_vm0 = vcmp.eq.s32.totalorder %v2811_v53, %v2780_v49 }
 0x1b1   : > { %v730_v24 = vpop.xlane.xlu1 %729  ;;  %v744_v1 = vpop.xlane.xlu0 %743  ;;  %v844_v15 = vcvt.f32.s32 %v2369_v20 }
 0x1b2   : > { %v920_v33 = vsel %vm2802_vm11, %v706_v23, 0  ;;  %v921_v11 = vsel %vm2804_vm12, %v720_v28, 0  ;;  %v731_v3 = vcvt.f32.s32 %v730_v24  ;;  %v745_v8 = vcvt.f32.s32 %v744_v1 }
 0x1b3   : > { %v948_v27 = vadd.s32 %v944_v42, %v920_v33  ;;  %v949_v58 = vadd.s32 %v945_v4, %v921_v11  ;;  %v831_v35 = vshll.u32 %v830_v36, 16 }
 0x1b4   : > { %v734_v60 = vadd.s32 %v733_v10, %v731_v3  ;;  %v748_v2 = vadd.s32 %v747_v47, %v745_v8  ;;  %v2813_v10 = vld [vmem:[#allocation44_spill] sm:$0xff]  ;;  %v845_v3 = vshll.u32 %v844_v15, 16  ;;  %v886_v8 = vcvt.f32.s32 %v2386_v63  ;;  %v2831_v15 = vld [vmem:[#allocation14_spill] sm:$0xff] }
 0x1b5   : > { %v758_v39 = vpop.xlane.xlu1 %757  ;;  %v772_v12 = vpop.xlane.xlu0 %771  ;;  %vm2814_vm1 = vcmp.eq.s32.totalorder %v2813_v10, %v2780_v49  ;;  %v900_v63 = vcvt.f32.s32 %v2388_v22 }
 0x1b6   : > { %v922_v6 = vsel %vm2806_vm13, %v734_v60, 0  ;;  %v923_v5 = vsel %vm2808_vm14, %v748_v2, 0  ;;  %v759_v38 = vcvt.f32.s32 %v758_v39  ;;  %v773_v26 = vcvt.f32.s32 %v772_v12  ;;  %v2817_v60 = vld [vmem:[#allocation46_spill] sm:$0xff] }
 0x1b7   : > { %v950_v37 = vadd.s32 %v946_v34, %v922_v6  ;;  %v951_v25 = vadd.s32 %v947_v52, %v923_v5  ;;  %v817_v34 = vshll.u32 %v816_v19, 16  ;;  %v858_v52 = vcvt.f32.s32 %v2377_v30 }
 0x1b8   : > { %v762_v42 = vadd.s32 %v761_v21, %v759_v38  ;;  %v776_v4 = vadd.s32 %v775_v51, %v773_v26  ;;  %v872_v30 = vcvt.f32.s32 %v2379_v45  ;;  %vm2818_vm3 = vcmp.eq.s32.totalorder %v2817_v60, %v2780_v49  ;;  %v2819_v21 = vld [vmem:[#allocation47_spill] sm:$0xff]  ;;  %v2821_v26 = vld [vmem:[#allocation48_spill] sm:$0xff] }
 0x1b9   : > { %v786_v0 = vpop.xlane.xlu1 %785  ;;  %v800_v14 = vpop.xlane.xlu0 %799  ;;  %v859_v20 = vshll.u32 %v858_v52, 16  ;;  %vm2820_vm4 = vcmp.eq.s32.totalorder %v2819_v21, %v2780_v49  ;;  %v887_v45 = vshll.u32 %v886_v8, 16  ;;  %vm2822_vm5 = vcmp.eq.s32.totalorder %v2821_v26, %v2780_v49  ;;  %v2836_v60 = vld [vmem:[#allocation23_spill] sm:$0xff] }
 0x1ba   : > { %v924_v46 = vsel %vm2810_vm15, %v762_v42, 0  ;;  %v925_v50 = vsel %vm2812_vm0, %v776_v4, 0  ;;  %v787_v62 = vcvt.f32.s32 %v786_v0  ;;  %v801_v40 = vcvt.f32.s32 %v800_v14 }
 0x1bb   : > { %v952_v9 = vadd.s32 %v948_v27, %v924_v46  ;;  %v953_v13 = vadd.s32 %v949_v58, %v925_v50  ;;  %v873_v57 = vshll.u32 %v872_v30, 16  ;;  %v901_v43 = vshll.u32 %v900_v63, 16  ;;  %v2825_v46 = vld [vmem:[#allocation52_spill] sm:$0xff]  ;;  %v2835_v30 = vld [vmem:[#allocation17_spill] sm:$0xff] }
 0x1bc   : > { %v790_v54 = vadd.s32 %v789_v61, %v787_v62  ;;  %v804_v44 = vadd.s32 %v803_v31, %v801_v40  ;;  %vm2826_vm7 = vcmp.eq.s32.totalorder %v2825_v46, %v2780_v49  ;;  %v2827_v62 = vld [vmem:[#allocation54_spill] sm:$0xff]  ;;  %v298_v52 = vand.u32 2147483647, %v2831_v15 }
 0x1bd   : > { %v814_v23 = vpop.xlane.xlu1 %813  ;;  %v828_v28 = vpop.xlane.xlu0 %827  ;;  %vm2828_vm8 = vcmp.eq.s32.totalorder %v2827_v62, %v2780_v49  ;;  %v981_v8 = vrot.slane %v2835_v30, %v2776_v56  ;;  %v335_v63 = vcvt.s32.f32 %v2777_v16 }
 0x1be   : > { %v926_v47 = vsel %vm2814_vm1, %v790_v54, 0  ;;  %v927_v17 = vsel %vm2816_vm2, %v804_v44, 0  ;;  %v815_v24 = vcvt.f32.s32 %v814_v23  ;;  %v829_v1 = vcvt.f32.s32 %v828_v28  ;;  %v2829_v54 = vld [vmem:[#allocation55_spill] sm:$0xff] }
 0x1bf   : > { %v954_v18 = vadd.s32 %v950_v37, %v926_v47  ;;  %v955_v33 = vadd.s32 %v951_v25, %v927_v17  ;;  %v2823_v25 = vld [vmem:[#allocation51_spill] sm:$0xff]  ;;  %vm2830_vm9 = vcmp.eq.s32.totalorder %v2829_v54, %v2780_v49  ;;  %v2833_v47 = vld [vmem:[#allocation12_spill] sm:$0xff]  ;;  %vm299_vm10 = vcmp.lt.f32.partialorder %v298_v52, 0.5 }
 0x1c0   : > { %v818_v55 = vadd.s32 %v817_v34, %v815_v24  ;;  %v832_v11 = vadd.s32 %v831_v35, %v829_v1  ;;  %vm2824_vm6 = vcmp.eq.s32.totalorder %v2823_v25, %v2780_v49  ;;  %v2832_v23 = vld [vmem:[#allocation15_spill] sm:$0xff]  ;;  %v295_v17 = vmul.f32 %v2834_v7, %v2833_v47 }
 0x1c1   : > { %v842_v27 = vpop.xlane.xlu1 %841  ;;  %v856_v58 = vpop.xlane.xlu0 %855  ;;  %v300_v28 = vand.u32 2147483647, %v2832_v23  ;;  %vm982_vm0 = vcmp.eq.s32.totalorder %v2779_v41, %v981_v8  ;;  %vm983_vm1 = vcmp.eq.s32.totalorder %v2778_v29, %v981_v8  ;;  %vm1081_vm2 = vcmask 130048  }
 0x1c2   : > { %v928_v2 = vsel %vm2818_vm3, %v818_v55, 0  ;;  %v929_v51 = vsel %vm2820_vm4, %v832_v11, 0  ;;  %v843_v59 = vcvt.f32.s32 %v842_v27  ;;  %v857_v32 = vcvt.f32.s32 %v856_v58 }
 0x1c3   : > { %v956_v39 = vadd.s32 %v952_v9, %v928_v2  ;;  %v957_v12 = vadd.s32 %v953_v13, %v929_v51  ;;  %vm301_vm11 = vcmp.lt.f32.partialorder %v300_v28, 0.5  ;;  %vm303_vm13 = vcmp.gt.f32.partialorder %v295_v17, 0.0 }
 0x1c4   : > { %v846_v48 = vadd.s32 %v845_v3, %v843_v59  ;;  %v860_v6 = vadd.s32 %v859_v20, %v857_v32  ;;  %vm302_vm12 = vmand %vm299_vm10, %vm301_vm11  ;;  %v1611_v55 = vmov 0.0   ;;  %v975_v3 = vld [vmem:[%s2625_s2] sm:$0x1]  ;;  %vm342_vm3 = vcmask 1040384  }
 0x1c5   : > { %v870_v5 = vpop.xlane.xlu1 %869  ;;  %v884_v38 = vpop.xlane.xlu0 %883  ;;  %vm304_vm14 = vmand %vm302_vm12, %vm303_vm13  ;;  %v1382_v51 = vsel %vm982_vm0, 1.0, %v1611_v55  ;;  %v1383_v59 = vsel %vm983_vm1, 1.0, %v1611_v55  ;;  %vm344_vm4 = vcmask 1041408  }
 0x1c6   : > { %v930_v37 = vsel %vm2822_vm5, %v846_v48, 0  ;;  %v931_v42 = vsel %vm2824_vm6, %v860_v6, 0  ;;  %v871_v4 = vcvt.f32.s32 %v870_v5  ;;  %v885_v61 = vcvt.f32.s32 %v884_v38  ;;  %v1079_v48 = vld [vmem:[%s2626_s3] sm:$0xff] }
 0x1c7   : > { %v958_v31 = vadd.s32 %v954_v18, %v930_v37  ;;  %v959_v19 = vadd.s32 %v955_v33, %v931_v42  ;;  %v1380_v11 = vsel %vm304_vm14, 1.0, %v1611_v55  ;;  %1423 = vmatprep.mubr.msk.f32.mxu1 %vm1081_vm2, %v1079_v48  ;;  %v340_v38 = vrot.slane %v335_v63, 6 }
 0x1c8   : > { %v874_v36 = vadd.s32 %v873_v57, %v871_v4  ;;  %v888_v0 = vadd.s32 %v887_v45, %v885_v61  ;;  %v976_v58 = vmul.f32 %v1380_v11, %v975_v3  ;;  %v334_v45 = vcvt.s32.f32 %v2835_v30 }
 0x1c9   : > { %v898_v14 = vpop.xlane.xlu1 %897  ;;  %vm346_vm5 = vcmask 1042432  }
 0x1ca   : > { %v932_v22 = vsel %vm2826_vm7, %v874_v36, 0  ;;  %v899_v53 = vcvt.f32.s32 %v898_v14  ;;  %v933_v40 = vsel %vm2828_vm8, %v888_v0, 0  ;;  %v337_v5 = vrot.slane %v334_v45, 7 }
 0x1cb   : > { %v960_v50 = vadd.s32 %v956_v39, %v932_v22  ;;  %v961_v34 = vadd.s32 %v957_v12, %v933_v40 }
 0x1cc   : > { %v902_v9 = vadd.s32 %v901_v43, %v899_v53  ;;  %v343_v26 = vsel %vm342_vm3, %v1380_v11, %v337_v5 }
 0x1cd   : > { %v963_v13 = vadd.s32 %v960_v50, %v959_v19  ;;  %v345_v37 = vsel %vm344_vm4, %v343_v26, %v340_v38 }
 0x1ce   : > { %v934_v44 = vsel %vm2830_vm9, %v902_v9, 0  ;;  %v347_v25 = vsel %vm346_vm5, %v345_v37, 0.0 }
 0x1cf   : > { %v962_v35 = vadd.s32 %v958_v31, %v934_v44  ;;  %348 = vst [vmem:[%s227_s26] sm:$0xff] %v347_v25 }
 0x1d1   : > { %v964_v10 = vadd.s32 %v962_v35, %v961_v34 }
 0x1d3   : > { %v965_v24 = vadd.s32 %v964_v10, %v963_v13 }
 0x1d5   : > { %v966_v1 = vrot.slane %v965_v24, 4 }
 0x1d7   : > { %v967_v18 = vadd.s32 %v966_v1, %v965_v24 }
 0x1d9   : > { %v968_v49 = vrot.slane %v967_v18, 2 }
 0x1db   : > { %v969_v33 = vadd.s32 %v968_v49, %v967_v18 }
 0x1dd   : > { %v970_v20 = vrot.slane %v969_v33, 1 }
 0x1df   : > { %v971_v27 = vadd.s32 %v970_v20, %v969_v33 }
 0x1e1   : > { %vm972_vm15 = vcmp.eq.s32.totalorder %v971_v27, %v2836_v60 }
 0x1e2   : > { %v1381_v2 = vsel %vm972_vm15, 1.0, %v1611_v55 }
 0x1e3   : > { %v977_v21 = vmul.f32 %v1381_v2, %v976_v58 }
 0x1e5   : > { %v1001_v32 = vrot.slane %v977_v21, %v2776_v56  ;;  %v1080_v56 = vld [vmem:[%s2626_s3 + $0x8] sm:$0xff] }
 0x1e7   : > { %v1002_v39 = vmul.f32 %v1382_v51, %v1001_v32  ;;  %v1003_v12 = vmul.f32 %v1383_v59, %v1001_v32 }
 0x1e9   : > { %1416 = vmatprep.mubr.f32.mxu0 %v1002_v39 }
 0x1ea   : > { %1417 = vmatmul.mubr.f32.vlgmr.msra.gmra.mxu0 %v1003_v12 }
 0x2aa   : > { %v1418_v41 = vpop.f32.mrf.mxu0 }
 0x2ab   : > { %1419 = vmatprep.subr.mxu1 %v1418_v41 }
 0x2ac   : > { %v1070_v29 = vpop.f32.mrf.mxu0  ;;  %1420 = vmatpush3.msra.mxu1 %v1418_v41 }
 0x2ad   : > { %1421 = vmatprep.subr.mxu1 %v1070_v29 }
 0x2ae   : > { %1422 = vmatpush3.msra.mxu1 %v1070_v29 }
 0x2af   : > { %1424 = vmatmul.mubr.msk.f32.vlgmr.msra.gmra.mxu1 %vm1081_vm2, %v1080_v56  ;;  %1426 = vmatprep.subr.mxu1 %v1080_v56 }
 0x2b0   : > { %1427 = vmatpush3.msra.mxu1 %v1080_v56 }
 0x2b1   : > { %1428 = vmatprep.subr.mxu1 %v1079_v48 }
 0x2b2   : > { %1429 = vmatpush3.msra.mxu1 %v1079_v48 }
 0x36f   : > { %v1425_v6 = vpop.f32.mrf.mxu1 }
 0x371   : > { %v1154_v57 = vpop.f32.mrf.mxu1 }
 0x372   : > { %1430 = vmatprep.mubr.msk.f32.mxu1 %vm1081_vm2, %v1154_v57 }
 0x373   : > { %1431 = vmatmul.mubr.msk.f32.vlgmr.msra.gmra.mxu1 %vm1081_vm2, %v1425_v6 }
 0x374   : > { %1526 = shalt.err (!%p1523_p1)
}
 0x375   : > { %s1527_s27 = scalar_lea.hbm %s1279_s7, 128  ;;  %s1531_s14 = scalar_lea.hbm %s2628_s5, 512 }
 0x376   : > { %p1528_p2 = scmp.ne.s32.totalorder %s1279_s7, %s1527_s27  ;;  %p1532_p7 = scmp.lt.s32.totalorder %s1279_s7, %s2628_s5 }
 0x377   : > { %p1533_p8 = scmp.lt.s32.totalorder %s1531_s14, %s1527_s27 }
 0x378   : > { %p1529_p3 = pnand %p1528_p2, %p1684_p5 }
 0x379   : > { %p1534_p9 = por %p1533_p8, %p1532_p7 }
 0x37a   : > { %p1530_p4 = pneg %p1529_p3 }
 0x37c   : > { %p1535_p10 = pnand %p1534_p9, %p1530_p4 }
 0x37e   : > { %1538 = shalt.err (!%p1535_p10)
}
 0x37f   : > { %1442 = dma.vmem_to_hbm [thread:$0]  (%p1684_p5), %s1282_s8, 128, %s1279_s7, %s1252_s9  }
 0x380   : > { %s1377_s25 = sshll.u32 %s2551_s23, 4  ;;  %s1399_s6 = sshll.u32 %s1667_s22, 8 }
 0x381   : > { %s220_s26 = scalar_lea.vmem [#allocation5], %s1377_s25  ;;  %s2579_s15 = scalar_lea.hbm %s2627_s4, %s1399_s6 }
 0x382   : > { %s1265_s30 = sshll.u32 %s220_s26, 4  ;;  %s1247_s7 = scalar_lea.sflag [#allocation3], %s2551_s23  ;;  %s2574_s30 = int_to_ptr.vmem [resolvable:$true] %s1265_s30 }
 0x383   : > { %s1539_s8 = scalar_lea.vmem %s2574_s30, 256  ;;  %s1613_s22 = smov [#allocation5]  }
 0x384   : > { %p1540_p11 = scmp.ne.s32.totalorder %s2574_s30, %s1539_s8  ;;  %s1543_s9 = sshll.u32 %s1613_s22, 4  ;;  %s1544_s9 = int_to_ptr.vmem [resolvable:$false] %s1543_s9 }
 0x385   : > { %s1545_s0 = scalar_lea.vmem %s1544_s9, 512  ;;  %p1546_p0 = scmp.lt.s32.totalorder %s2574_s30, %s1544_s9 }
 0x386   : > { %p1541_p12 = pnand %p1540_p11, %p1684_p5  ;;  %p1547_p1 = scmp.lt.s32.totalorder %s1545_s0, %s1539_s8 }
 0x388   : > { %p1542_p13 = pneg %p1541_p12  ;;  %p1548_p2 = por %p1547_p1, %p1546_p0 }
 0x38a   : > { %p1549_p3 = pnand %p1548_p2, %p1542_p13 }
 0x433   : > { %v1432_v16 = vpop.f32.mrf.mxu1 }
 0x434   : > { %1245 = vst.msk [vmem:[%s220_s26 + $0x8] sm:$0xff] %vm1081_vm2, %v1432_v16 }
 0x435   : > { %v1235_v42 = vpop.f32.mrf.mxu1 }
 0x436   : > { %1244 = vst.msk [vmem:[%s220_s26] sm:$0xff] %vm1081_vm2, %v1235_v42 }
 0x437   : > { %1552 = shalt.err (!%p1549_p3)
}
 0x438   : > { %s1553_s27 = scalar_lea.hbm %s2579_s15, 256  ;;  %s1557_s14 = scalar_lea.hbm %s2627_s4, 1024 }
 0x439   : > { %p1554_p4 = scmp.ne.s32.totalorder %s2579_s15, %s1553_s27  ;;  %p1558_p9 = scmp.lt.s32.totalorder %s2579_s15, %s2627_s4 }
 0x43a   : > { %p1559_p10 = scmp.lt.s32.totalorder %s1557_s14, %s1553_s27 }
 0x43b   : > { %p1555_p7 = pnand %p1554_p4, %p1684_p5 }
 0x43c   : > { %p1560_p11 = por %p1559_p10, %p1558_p9 }
 0x43d   : > { %p1556_p8 = pneg %p1555_p7 }
 0x43f   : > { %p1561_p12 = pnand %p1560_p11, %p1556_p8 }
 0x441   : > { %1564 = shalt.err (!%p1561_p12)
}
 0x442   : > { %s1614_s25 = smov 128   ;;  %s1615_s26 = smov 8  }
 0x443   : > { %1441 = dma.vmem_to_hbm [thread:$0]  (%p1684_p5), %s2574_s30, 256, %s2579_s15, %s1247_s7, %s1614_s25, %s1614_s25, %s1615_s26  }
 0x444 PF: > { %p1458_p13 = scmp.ge.s32.totalorder %s1607_s21, 2  ;;  %s1293_s6 = sand.u32 1, %s1595_s18  }
 0x445   : > { %s1294_s10 = scalar_lea.sflag [#allocation3], %s1293_s6 }
 0x446   : > { %p1450_p0 = pnand %p1458_p13, %p1688_p6 }
 0x448   : > { %p1451_p1 = pneg %p1450_p0 }
 0x44a   : > { %1586 = dma.done.wait (%p1451_p1), %s1294_s10, 256  }
 0x44b   : > { %1588 = vsyncadd (%p1451_p1), %s1294_s10, 4294967040  ;;  %s1303_s13 = scalar_lea.sflag [#allocation7], %s1293_s6 }
 0x44c   : > { %1590 = dma.done.wait (%p1451_p1), %s1303_s13, 128  }
 0x44d   : > { %1592 = vsyncadd (%p1451_p1), %s1303_s13, 4294967168  ;;  %s2837_s28 = sld [smem:[#allocation11_spill]]  ;;  %p20_p5 = scmp.ge.s32.totalorder %s1671_s24, 6  }
 0x44e   : > { %s2838_s18 = smov %s1599_s19  ;;  %s2839_s19 = smov %s1603_s20 }
 0x44f   : > { %s2841_s21 = smov %s1671_s24  ;;  %22 = sbr.rel (!%p20_p5) target bundleno = 8 (0x8), region = 90 }
 0x453   : > { %s2840_s20 = smov %s2837_s28 }
 0x454   :  { %1308 = vsyncpa [#allocation3], 1 }
 0x455   :  { %1310 = vsyncpa [#allocation3 + $0x1], 1 }
 0x456   :  { %1311 = vsyncpa [#allocation7], 1 }
 0x457   :  { %1313 = vsyncpa [#allocation7 + $0x1], 1 }
 0x458   :  { %1314 = vsyncpa [#allocation4], 1 }
 0x459   :  { %1316 = vsyncpa [#allocation4 + $0x1], 1 }

</bundles_post_ra>
